<compile_context>
chip_gen: v7x
topology: tpu7x:2x2x1
jax: 0.10.0
libtpu: 0.0.40
codegen_flags: <defaults>
</compile_context>

<pallas_src>
import numpy as np
import jax
import jax.numpy as jnp
from jax.experimental import pallas as pl
from jax.experimental.pallas import tpu as pltpu


def contm_kernel(alpha_ref, x_ref, wgu_ref, bg_ref, wo_ref, bo_ref, o_ref):
    tb, t, d = x_ref.shape          # (TB, T, D) block of this grid step
    m = tb * t
    scale = d ** -0.5

    x_bf = x_ref[...]                          # (TB, T, D) bf16 (MXU operand)
    x_f32 = x_bf.astype(jnp.float32)           # f32 for element-wise math

    # ---- CAM: temporal self-attention context (per batch element) ----
    # einsum lowers to dot_general with batch dim 0 and contraction over D:
    # no explicit x.T / cross-lane transpose is materialized.
    s = jnp.einsum("btd,bsd->bts", x_bf, x_bf,
                   preferred_element_type=jnp.float32) * scale      # (TB,T,T)
    s = s - jnp.max(s, axis=-1, keepdims=True)
    p = jnp.exp(s)
    inv_den = pl.reciprocal(jnp.sum(p, axis=-1, keepdims=True), approx=True)
    attn = p * inv_den                                              # (TB,T,T)
    ctx = jnp.einsum("bts,bsd->btd", attn.astype(jnp.bfloat16), x_bf,
                     preferred_element_type=jnp.float32)            # (TB,T,D)
    alpha = alpha_ref[0]
    context_feat = alpha * ctx + x_f32                              # (TB,T,D) f32

    # ---- CFM: gated fusion, flattened to (TB*T, D) rows for full MXU use ----
    # Reshapes are done in f32 (T is sublane-tile aligned for f32 -> no-op).
    x2 = x_f32.reshape(m, d)
    c2 = context_feat.reshape(m, d)
    xc = jnp.concatenate([x2, c2], axis=-1).astype(jnp.bfloat16)    # (M, 2D)
    g_lin = jnp.dot(xc, wgu_ref[...],
                    preferred_element_type=jnp.float32) + bg_ref[...]
    g = jax.nn.sigmoid(g_lin)                                       # (M, D) f32
    fused = g * x2 + (1.0 - g) * c2                                 # (M, D) f32
    out = jnp.dot(fused.astype(jnp.bfloat16), wo_ref[...],
                  preferred_element_type=jnp.float32) + bo_ref[...] # (M, D) f32

    o_ref[...] = out.reshape(tb, t, d).astype(o_ref.dtype)


def contm_forward(x, params, *, tb=None, single_buffer_weights=True):
    """x: [B, T, D] float. params: dict of weights. Returns [B, T, D] (x.dtype)."""
    B, T, D = x.shape
    if tb is None:
        # Target ~256 flattened rows per block (>=128 saturates the v5e MXU,
        # 256 the v6e/v7x MXU); must divide B.
        tb = max(1, min(B, 256 // max(T, 1)))
        while B % tb:
            tb -= 1
    assert B % tb == 0, "batch must be divisible by the batch-block size"
    grid = (B // tb,)

    # bf16 MXU operands, f32 accumulation/bias.  In a real model x / weights
    # would already be stored in bf16; the casts here are one-time wrapper ops.
    x_bf = x.astype(jnp.bfloat16)
    wgu = jnp.concatenate([params["wg"], params["ug"]], axis=0).astype(jnp.bfloat16)
    wo = params["wo"].astype(jnp.bfloat16)
    bg = params["bg"].astype(jnp.float32)
    bo = params["bo"].astype(jnp.float32)
    alpha = params["alpha"].astype(jnp.float32)

    def weight_spec(shape):
        # Constant index_map -> the weight block never changes across the grid;
        # single-buffer it to halve its VMEM residency (key for v7x @ D=2048).
        if single_buffer_weights:
            return pl.BlockSpec(shape, lambda b: (0, 0),
                                pipeline_mode=pl.Buffered(1))
        return pl.BlockSpec(shape, lambda b: (0, 0))

    out_itemsize = x.dtype.itemsize
    # ---- VMEM accounting (explicit limit; default scoped limits are 16/32 MiB) ----
    w_bytes = (2 * D * D + D * D) * 2 * (1 if single_buffer_weights else 2)
    io_bytes = 2 * tb * T * D * 2 + 2 * tb * T * D * out_itemsize     # dbl-buffered x/out
    work_bytes = 8 * tb * T * D * 4 + 4 * tb * T * T * 4              # in-kernel temporaries
    vmem_limit = int(min(max(w_bytes + io_bytes + work_bytes + (4 << 20),
                             32 << 20),
                         64 << 20))                                   # <= v7x per-TC VMEM

    cost = pl.CostEstimate(
        flops=int(B * (4 * T * T * D + 6 * T * D * D)),
        transcendentals=int(B * T * T + B * T * D),
        bytes_accessed=int(3 * D * D * 2 + 2 * D * 4
                           + B * T * D * 2 + B * T * D * out_itemsize),
    )

    grid_spec = pltpu.PrefetchScalarGridSpec(
        num_scalar_prefetch=0,
        grid=grid,
        in_specs=[
            pl.BlockSpec(memory_space=pltpu.MemorySpace.SMEM),   # alpha (1,)
            pl.BlockSpec((tb, T, D), lambda b: (b, 0, 0)),       # x  (bf16)
            weight_spec((2 * D, D)),                             # [Wg; Ug] (bf16)
            pl.BlockSpec((1, D), lambda b: (0, 0)),              # bg (f32)
            weight_spec((D, D)),                                 # Wo (bf16)
            pl.BlockSpec((1, D), lambda b: (0, 0)),              # bo (f32)
        ],
        out_specs=pl.BlockSpec((tb, T, D), lambda b: (b, 0, 0)),
    )

    return pl.pallas_call(
        contm_kernel,
        out_shape=jax.ShapeDtypeStruct((B, T, D), x.dtype),
        grid_spec=grid_spec,
        compiler_params=pltpu.CompilerParams(
            dimension_semantics=("parallel",),     # batch-block axis -> megacore
            vmem_limit_bytes=vmem_limit),
        cost_estimate=cost,
    )(alpha, x_bf, wgu, bg, wo, bo)


def contm_reference(x, params):
    """Pure-JAX reference mirroring the kernel's bf16-operand / f32-accum math."""
    xb = x.astype(jnp.bfloat16)
    xf = xb.astype(jnp.float32)
    D = x.shape[-1]
    s = jnp.einsum("btd,bsd->bts", xb, xb,
                   preferred_element_type=jnp.float32) * (D ** -0.5)
    a = jax.nn.softmax(s, axis=-1)
    ctx = jnp.einsum("bts,bsd->btd", a.astype(jnp.bfloat16), xb,
                     preferred_element_type=jnp.float32)
    context = params["alpha"][0] * ctx + xf
    wgu = jnp.concatenate([params["wg"], params["ug"]], axis=0).astype(jnp.bfloat16)
    xc = jnp.concatenate([xf, context], axis=-1).astype(jnp.bfloat16)
    g = jax.nn.sigmoid(jnp.einsum("btk,kd->btd", xc, wgu,
                                  preferred_element_type=jnp.float32)
                       + params["bg"])
    fused = g * xf + (1.0 - g) * context
    out = jnp.einsum("btd,de->bte", fused.astype(jnp.bfloat16),
                     params["wo"].astype(jnp.bfloat16),
                     preferred_element_type=jnp.float32) + params["bo"]
    return out.astype(x.dtype)


def init_params(key, d_model):
    k1, k2, k3 = jax.random.split(key, 3)
    scale = 1.0 / np.sqrt(d_model)
    return {
        # learnable_alpha=False in the module default -> fixed scalar 1.0
        "alpha": jnp.ones((1,), jnp.float32),
        "wg": jax.random.normal(k1, (d_model, d_model), jnp.float32) * scale,
        "ug": jax.random.normal(k2, (d_model, d_model), jnp.float32) * scale,
        "bg": jnp.zeros((1, d_model), jnp.float32),
        "wo": jax.random.normal(k3, (d_model, d_model), jnp.float32) * scale,
        "bo": jnp.zeros((1, d_model), jnp.float32),
    }


if __name__ == "__main__":
    # Small shapes consistent with the module's forward ([B, T, d_model]).
    # TB=4 -> grid=(2,): exercises batch-block pipelining and keeps the grid
    # even so both v7x TensorCores are used; d_model shrunk 2048 -> 256.
    B, T, D = 8, 8, 256
    key = jax.random.PRNGKey(0)
    kx, kp = jax.random.split(key)
    x = jax.random.normal(kx, (B, T, D), jnp.float32)
    params = init_params(kp, D)

    try:
        out = jax.block_until_ready(contm_forward(x, params, tb=4))
    except Exception:
        # Fallback for jax builds without BlockSpec pipeline_mode support:
        # identical kernel, weights default (double) buffered.
        out = jax.block_until_ready(
            contm_forward(x, params, tb=4, single_buffer_weights=False))

    ref = jax.block_until_ready(contm_reference(x, params))
    assert out.shape == (B, T, D)
    np.testing.assert_allclose(np.asarray(out), np.asarray(ref),
                               rtol=3e-2, atol=3e-2)
    print("KERNEL_OK")
</pallas_src>

<mosaic_0001>
module attributes {stable_mosaic.version = 11 : i64} {
  func.func @contm_kernel(%arg0: i32, %arg1: memref<1xf32, #tpu.memory_space<smem>>, %arg2: memref<4x8x256xbf16, #tpu.memory_space<vmem>>, %arg3: memref<512x256xbf16, #tpu.memory_space<vmem>>, %arg4: memref<1x256xf32, #tpu.memory_space<vmem>>, %arg5: memref<256x256xbf16, #tpu.memory_space<vmem>>, %arg6: memref<1x256xf32, #tpu.memory_space<vmem>>, %arg7: memref<4x8x256xf32, #tpu.memory_space<vmem>>) attributes {dimension_semantics = [#tpu.dimension_semantics<parallel>], iteration_bounds = array<i64: 2>, scalar_prefetch = 0 : i64, scratch_operands = 0 : i64, tpu.core_type = #tpu.core_type<tc>, window_params = [{transform_indices = @transform_0, window_bounds = array<i64: 1>}, {transform_indices = @transform_1, window_bounds = array<i64: 4, 8, 256>}, {pipeline_mode = #tpu.pipeline_mode<synchronous>, transform_indices = @transform_2, window_bounds = array<i64: 512, 256>}, {pipeline_mode = #tpu.pipeline_mode<synchronous>, transform_indices = @transform_3, window_bounds = array<i64: 1, 256>}, {pipeline_mode = #tpu.pipeline_mode<synchronous>, transform_indices = @transform_4, window_bounds = array<i64: 256, 256>}, {pipeline_mode = #tpu.pipeline_mode<synchronous>, transform_indices = @transform_5, window_bounds = array<i64: 1, 256>}, {transform_indices = @transform_6, window_bounds = array<i64: 4, 8, 256>}]} {
    %c0 = arith.constant 0 : index
    %c0_0 = arith.constant 0 : index
    %c0_1 = arith.constant 0 : index
    %0 = vector.load %arg2[%c0, %c0_0, %c0_1] : memref<4x8x256xbf16, #tpu.memory_space<vmem>>, vector<4x8x256xbf16>
    %1 = arith.extf %0 : vector<4x8x256xbf16> to vector<4x8x256xf32>
    "tpu.trace_start"() <{level = 10 : i32, message = "btd,bsd->bts"}> : () -> ()
    %cst = arith.constant dense<0.000000e+00> : vector<4x8x8xf32>
    %2 = tpu.matmul %0, %0, %cst {dimension_numbers = #tpu.dot_dimension_numbers<[2], [2], [1], [1], [0, 0, 0, 1, 1, 1], [0], [0]>} : vector<4x8x256xbf16>, vector<4x8x256xbf16>, vector<4x8x8xf32> -> vector<4x8x8xf32>
    "tpu.trace_stop"() : () -> ()
    %cst_2 = arith.constant 6.250000e-02 : f32
    %3 = vector.broadcast %cst_2 : f32 to vector<4x8x8xf32>
    %4 = arith.mulf %2, %3 : vector<4x8x8xf32>
    %cst_3 = arith.constant dense<0xFF800000> : vector<4x8xf32>
    %5 = vector.multi_reduction <maximumf>, %4, %cst_3 [2] : vector<4x8x8xf32> to vector<4x8xf32>
    %6 = vector.shape_cast %5 : vector<4x8xf32> to vector<4x8x1xf32>
    %7 = vector.broadcast %6 : vector<4x8x1xf32> to vector<4x8x8xf32>
    %8 = arith.subf %4, %7 : vector<4x8x8xf32>
    %9 = math.exp %8 : vector<4x8x8xf32>
    %cst_4 = arith.constant dense<0.000000e+00> : vector<4x8xf32>
    %10 = vector.multi_reduction <add>, %9, %cst_4 [2] : vector<4x8x8xf32> to vector<4x8xf32>
    %11 = vector.shape_cast %10 : vector<4x8xf32> to vector<4x8x1xf32>
    %12 = tpu.reciprocal %11 {approx = true} : vector<4x8x1xf32> -> vector<4x8x1xf32>
    %13 = vector.broadcast %12 : vector<4x8x1xf32> to vector<4x8x8xf32>
    %14 = arith.mulf %9, %13 : vector<4x8x8xf32>
    %15 = arith.truncf %14 : vector<4x8x8xf32> to vector<4x8x8xbf16>
    "tpu.trace_start"() <{level = 10 : i32, message = "bts,bsd->btd"}> : () -> ()
    %cst_5 = arith.constant dense<0.000000e+00> : vector<4x8x256xf32>
    %16 = tpu.matmul %15, %0, %cst_5 {dimension_numbers = #tpu.dot_dimension_numbers<[2], [1], [1], [2], [0, 0, 0, 1, 1, 2], [0], [0]>} : vector<4x8x8xbf16>, vector<4x8x256xbf16>, vector<4x8x256xf32> -> vector<4x8x256xf32>
    "tpu.trace_stop"() : () -> ()
    %c0_6 = arith.constant 0 : index
    %17 = memref.load %arg1[%c0_6] : memref<1xf32, #tpu.memory_space<smem>>
    %18 = vector.broadcast %17 : f32 to vector<4x8x256xf32>
    %19 = arith.mulf %18, %16 : vector<4x8x256xf32>
    %20 = arith.addf %19, %1 : vector<4x8x256xf32>
    %21 = vector.shape_cast %1 : vector<4x8x256xf32> to vector<32x256xf32>
    %22 = vector.shape_cast %20 : vector<4x8x256xf32> to vector<32x256xf32>
    %23 = tpu.concatenate %21, %22 in 1 : vector<32x256xf32>, vector<32x256xf32> -> vector<32x512xf32>
    %24 = arith.truncf %23 : vector<32x512xf32> to vector<32x512xbf16>
    %c0_7 = arith.constant 0 : index
    %c0_8 = arith.constant 0 : index
    %25 = vector.load %arg3[%c0_7, %c0_8] : memref<512x256xbf16, #tpu.memory_space<vmem>>, vector<512x256xbf16>
    %cst_9 = arith.constant dense<0.000000e+00> : vector<32x256xf32>
    %26 = tpu.matmul %24, %25, %cst_9 {dimension_numbers = #tpu.dot_dimension_numbers<[1], [0], [0], [1], [0, 0, 1, 1], [], []>} : vector<32x512xbf16>, vector<512x256xbf16>, vector<32x256xf32> -> vector<32x256xf32>
    %c0_10 = arith.constant 0 : index
    %c0_11 = arith.constant 0 : index
    %27 = vector.load %arg4[%c0_10, %c0_11] : memref<1x256xf32, #tpu.memory_space<vmem>>, vector<1x256xf32>
    %28 = vector.broadcast %27 : vector<1x256xf32> to vector<32x256xf32>
    %29 = arith.addf %26, %28 : vector<32x256xf32>
    %30 = arith.negf %29 : vector<32x256xf32>
    %31 = math.exp %30 : vector<32x256xf32>
    %cst_12 = arith.constant 1.000000e+00 : f32
    %32 = vector.broadcast %cst_12 : f32 to vector<32x256xf32>
    %33 = arith.addf %32, %31 : vector<32x256xf32>
    %34 = arith.divf %32, %33 : vector<32x256xf32>
    %35 = arith.mulf %34, %21 : vector<32x256xf32>
    %cst_13 = arith.constant 1.000000e+00 : f32
    %36 = vector.broadcast %cst_13 : f32 to vector<32x256xf32>
    %37 = arith.subf %36, %34 : vector<32x256xf32>
    %38 = arith.mulf %37, %22 : vector<32x256xf32>
    %39 = arith.addf %35, %38 : vector<32x256xf32>
    %40 = arith.truncf %39 : vector<32x256xf32> to vector<32x256xbf16>
    %c0_14 = arith.constant 0 : index
    %c0_15 = arith.constant 0 : index
    %41 = vector.load %arg5[%c0_14, %c0_15] : memref<256x256xbf16, #tpu.memory_space<vmem>>, vector<256x256xbf16>
    %cst_16 = arith.constant dense<0.000000e+00> : vector<32x256xf32>
    %42 = tpu.matmul %40, %41, %cst_16 {dimension_numbers = #tpu.dot_dimension_numbers<[1], [0], [0], [1], [0, 0, 1, 1], [], []>} : vector<32x256xbf16>, vector<256x256xbf16>, vector<32x256xf32> -> vector<32x256xf32>
    %c0_17 = arith.constant 0 : index
    %c0_18 = arith.constant 0 : index
    %43 = vector.load %arg6[%c0_17, %c0_18] : memref<1x256xf32, #tpu.memory_space<vmem>>, vector<1x256xf32>
    %44 = vector.broadcast %43 : vector<1x256xf32> to vector<32x256xf32>
    %45 = arith.addf %42, %44 : vector<32x256xf32>
    %46 = vector.shape_cast %45 : vector<32x256xf32> to vector<4x8x256xf32>
    %c0_19 = arith.constant 0 : index
    %c0_20 = arith.constant 0 : index
    %c0_21 = arith.constant 0 : index
    %47 = vector.load %arg7[%c0_19, %c0_20, %c0_21] : memref<4x8x256xf32, #tpu.memory_space<vmem>>, vector<4x8x256xf32>
    tpu.vector_store %arg7[%c0_19, %c0_20, %c0_21], %46 {strides = array<i32>} : memref<4x8x256xf32, #tpu.memory_space<vmem>>, vector<4x8x256xf32>,
    return
  }
  func.func @transform_0(%arg0: i32) -> i32 {
    %c0_i32 = arith.constant 0 : i32
    %c0_i32_0 = arith.constant 0 : i32
    return %c0_i32 : i32
  }
  func.func @transform_1(%arg0: i32) -> (i32, i32, i32) {
    %c0_i32 = arith.constant 0 : i32
    %c0_i32_0 = arith.constant 0 : i32
    %c0_i32_1 = arith.constant 0 : i32
    return %arg0, %c0_i32, %c0_i32_0 : i32, i32, i32
  }
  func.func @transform_2(%arg0: i32) -> (i32, i32) {
    %c0_i32 = arith.constant 0 : i32
    %c0_i32_0 = arith.constant 0 : i32
    %c0_i32_1 = arith.constant 0 : i32
    return %c0_i32, %c0_i32_0 : i32, i32
  }
  func.func @transform_3(%arg0: i32) -> (i32, i32) {
    %c0_i32 = arith.constant 0 : i32
    %c0_i32_0 = arith.constant 0 : i32
    %c0_i32_1 = arith.constant 0 : i32
    return %c0_i32, %c0_i32_0 : i32, i32
  }
  func.func @transform_4(%arg0: i32) -> (i32, i32) {
    %c0_i32 = arith.constant 0 : i32
    %c0_i32_0 = arith.constant 0 : i32
    %c0_i32_1 = arith.constant 0 : i32
    return %c0_i32, %c0_i32_0 : i32, i32
  }
  func.func @transform_5(%arg0: i32) -> (i32, i32) {
    %c0_i32 = arith.constant 0 : i32
    %c0_i32_0 = arith.constant 0 : i32
    %c0_i32_1 = arith.constant 0 : i32
    return %c0_i32, %c0_i32_0 : i32, i32
  }
  func.func @transform_6(%arg0: i32) -> (i32, i32, i32) {
    %c0_i32 = arith.constant 0 : i32
    %c0_i32_0 = arith.constant 0 : i32
    %c0_i32_1 = arith.constant 0 : i32
    return %arg0, %c0_i32, %c0_i32_0 : i32, i32, i32
  }
}

module attributes {stable_mosaic.version = 11 : i64} {
  func.func @contm_kernel(%arg0: i32, %arg1: memref<1xf32, #tpu.memory_space<smem>>, %arg2: memref<4x8x256xbf16, #tpu.memory_space<vmem>>, %arg3: memref<512x256xbf16, #tpu.memory_space<vmem>>, %arg4: memref<1x256xf32, #tpu.memory_space<vmem>>, %arg5: memref<256x256xbf16, #tpu.memory_space<vmem>>, %arg6: memref<1x256xf32, #tpu.memory_space<vmem>>, %arg7: memref<4x8x256xf32, #tpu.memory_space<vmem>>) attributes {dimension_semantics = [#tpu.dimension_semantics<parallel>], iteration_bounds = array<i64: 2>, scalar_prefetch = 0 : i64, scratch_operands = 0 : i64, tpu.core_type = #tpu.core_type<tc>, window_params = [{transform_indices = @transform_0, window_bounds = array<i64: 1>}, {transform_indices = @transform_1, window_bounds = array<i64: 4, 8, 256>}, {pipeline_mode = #tpu.pipeline_mode<synchronous>, transform_indices = @transform_2, window_bounds = array<i64: 512, 256>}, {pipeline_mode = #tpu.pipeline_mode<synchronous>, transform_indices = @transform_3, window_bounds = array<i64: 1, 256>}, {pipeline_mode = #tpu.pipeline_mode<synchronous>, transform_indices = @transform_4, window_bounds = array<i64: 256, 256>}, {pipeline_mode = #tpu.pipeline_mode<synchronous>, transform_indices = @transform_5, window_bounds = array<i64: 1, 256>}, {transform_indices = @transform_6, window_bounds = array<i64: 4, 8, 256>}]} {
    %c0 = arith.constant 0 : index
    %c0_0 = arith.constant 0 : index
    %c0_1 = arith.constant 0 : index
    %0 = vector.load %arg2[%c0, %c0_0, %c0_1] : memref<4x8x256xbf16, #tpu.memory_space<vmem>>, vector<4x8x256xbf16>
    %1 = arith.extf %0 : vector<4x8x256xbf16> to vector<4x8x256xf32>
    "tpu.trace_start"() <{level = 10 : i32, message = "btd,bsd->bts"}> : () -> ()
    %cst = arith.constant dense<0.000000e+00> : vector<4x8x8xf32>
    %2 = tpu.matmul %0, %0, %cst {dimension_numbers = #tpu.dot_dimension_numbers<[2], [2], [1], [1], [0, 0, 0, 1, 1, 1], [0], [0]>} : vector<4x8x256xbf16>, vector<4x8x256xbf16>, vector<4x8x8xf32> -> vector<4x8x8xf32>
    "tpu.trace_stop"() : () -> ()
    %cst_2 = arith.constant 6.250000e-02 : f32
    %3 = vector.broadcast %cst_2 : f32 to vector<4x8x8xf32>
    %4 = arith.mulf %2, %3 : vector<4x8x8xf32>
    %cst_3 = arith.constant dense<0xFF800000> : vector<4x8xf32>
    %5 = vector.multi_reduction <maximumf>, %4, %cst_3 [2] : vector<4x8x8xf32> to vector<4x8xf32>
    %6 = vector.shape_cast %5 : vector<4x8xf32> to vector<4x8x1xf32>
    %7 = vector.broadcast %6 : vector<4x8x1xf32> to vector<4x8x8xf32>
    %8 = arith.subf %4, %7 : vector<4x8x8xf32>
    %9 = math.exp %8 : vector<4x8x8xf32>
    %cst_4 = arith.constant dense<0.000000e+00> : vector<4x8xf32>
    %10 = vector.multi_reduction <add>, %9, %cst_4 [2] : vector<4x8x8xf32> to vector<4x8xf32>
    %11 = vector.shape_cast %10 : vector<4x8xf32> to vector<4x8x1xf32>
    %12 = tpu.reciprocal %11 {approx = true} : vector<4x8x1xf32> -> vector<4x8x1xf32>
    %13 = vector.broadcast %12 : vector<4x8x1xf32> to vector<4x8x8xf32>
    %14 = arith.mulf %9, %13 : vector<4x8x8xf32>
    %15 = arith.truncf %14 : vector<4x8x8xf32> to vector<4x8x8xbf16>
    "tpu.trace_start"() <{level = 10 : i32, message = "bts,bsd->btd"}> : () -> ()
    %cst_5 = arith.constant dense<0.000000e+00> : vector<4x8x256xf32>
    %16 = tpu.matmul %15, %0, %cst_5 {dimension_numbers = #tpu.dot_dimension_numbers<[2], [1], [1], [2], [0, 0, 0, 1, 1, 2], [0], [0]>} : vector<4x8x8xbf16>, vector<4x8x256xbf16>, vector<4x8x256xf32> -> vector<4x8x256xf32>
    "tpu.trace_stop"() : () -> ()
    %c0_6 = arith.constant 0 : index
    %17 = memref.load %arg1[%c0_6] : memref<1xf32, #tpu.memory_space<smem>>
    %18 = vector.broadcast %17 : f32 to vector<4x8x256xf32>
    %19 = arith.mulf %18, %16 : vector<4x8x256xf32>
    %20 = arith.addf %19, %1 : vector<4x8x256xf32>
    %21 = vector.shape_cast %1 : vector<4x8x256xf32> to vector<32x256xf32>
    %22 = vector.shape_cast %20 : vector<4x8x256xf32> to vector<32x256xf32>
    %23 = tpu.concatenate %21, %22 in 1 : vector<32x256xf32>, vector<32x256xf32> -> vector<32x512xf32>
    %24 = arith.truncf %23 : vector<32x512xf32> to vector<32x512xbf16>
    %c0_7 = arith.constant 0 : index
    %c0_8 = arith.constant 0 : index
    %25 = vector.load %arg3[%c0_7, %c0_8] : memref<512x256xbf16, #tpu.memory_space<vmem>>, vector<512x256xbf16>
    %cst_9 = arith.constant dense<0.000000e+00> : vector<32x256xf32>
    %26 = tpu.matmul %24, %25, %cst_9 {dimension_numbers = #tpu.dot_dimension_numbers<[1], [0], [0], [1], [0, 0, 1, 1], [], []>} : vector<32x512xbf16>, vector<512x256xbf16>, vector<32x256xf32> -> vector<32x256xf32>
    %c0_10 = arith.constant 0 : index
    %c0_11 = arith.constant 0 : index
    %27 = vector.load %arg4[%c0_10, %c0_11] : memref<1x256xf32, #tpu.memory_space<vmem>>, vector<1x256xf32>
    %28 = vector.broadcast %27 : vector<1x256xf32> to vector<32x256xf32>
    %29 = arith.addf %26, %28 : vector<32x256xf32>
    %30 = arith.negf %29 : vector<32x256xf32>
    %31 = math.exp %30 : vector<32x256xf32>
    %cst_12 = arith.constant 1.000000e+00 : f32
    %32 = vector.broadcast %cst_12 : f32 to vector<32x256xf32>
    %33 = arith.addf %32, %31 : vector<32x256xf32>
    %34 = arith.divf %32, %33 : vector<32x256xf32>
    %35 = arith.mulf %34, %21 : vector<32x256xf32>
    %cst_13 = arith.constant 1.000000e+00 : f32
    %36 = vector.broadcast %cst_13 : f32 to vector<32x256xf32>
    %37 = arith.subf %36, %34 : vector<32x256xf32>
    %38 = arith.mulf %37, %22 : vector<32x256xf32>
    %39 = arith.addf %35, %38 : vector<32x256xf32>
    %40 = arith.truncf %39 : vector<32x256xf32> to vector<32x256xbf16>
    %c0_14 = arith.constant 0 : index
    %c0_15 = arith.constant 0 : index
    %41 = vector.load %arg5[%c0_14, %c0_15] : memref<256x256xbf16, #tpu.memory_space<vmem>>, vector<256x256xbf16>
    %cst_16 = arith.constant dense<0.000000e+00> : vector<32x256xf32>
    %42 = tpu.matmul %40, %41, %cst_16 {dimension_numbers = #tpu.dot_dimension_numbers<[1], [0], [0], [1], [0, 0, 1, 1], [], []>} : vector<32x256xbf16>, vector<256x256xbf16>, vector<32x256xf32> -> vector<32x256xf32>
    %c0_17 = arith.constant 0 : index
    %c0_18 = arith.constant 0 : index
    %43 = vector.load %arg6[%c0_17, %c0_18] : memref<1x256xf32, #tpu.memory_space<vmem>>, vector<1x256xf32>
    %44 = vector.broadcast %43 : vector<1x256xf32> to vector<32x256xf32>
    %45 = arith.addf %42, %44 : vector<32x256xf32>
    %46 = vector.shape_cast %45 : vector<32x256xf32> to vector<4x8x256xf32>
    %c0_19 = arith.constant 0 : index
    %c0_20 = arith.constant 0 : index
    %c0_21 = arith.constant 0 : index
    %47 = vector.load %arg7[%c0_19, %c0_20, %c0_21] : memref<4x8x256xf32, #tpu.memory_space<vmem>>, vector<4x8x256xf32>
    tpu.vector_store %arg7[%c0_19, %c0_20, %c0_21], %46 {strides = array<i32>} : memref<4x8x256xf32, #tpu.memory_space<vmem>>, vector<4x8x256xf32>,
    return
  }
  func.func @transform_0(%arg0: i32) -> i32 {
    %c0_i32 = arith.constant 0 : i32
    %c0_i32_0 = arith.constant 0 : i32
    return %c0_i32 : i32
  }
  func.func @transform_1(%arg0: i32) -> (i32, i32, i32) {
    %c0_i32 = arith.constant 0 : i32
    %c0_i32_0 = arith.constant 0 : i32
    %c0_i32_1 = arith.constant 0 : i32
    return %arg0, %c0_i32, %c0_i32_0 : i32, i32, i32
  }
  func.func @transform_2(%arg0: i32) -> (i32, i32) {
    %c0_i32 = arith.constant 0 : i32
    %c0_i32_0 = arith.constant 0 : i32
    %c0_i32_1 = arith.constant 0 : i32
    return %c0_i32, %c0_i32_0 : i32, i32
  }
  func.func @transform_3(%arg0: i32) -> (i32, i32) {
    %c0_i32 = arith.constant 0 : i32
    %c0_i32_0 = arith.constant 0 : i32
    %c0_i32_1 = arith.constant 0 : i32
    return %c0_i32, %c0_i32_0 : i32, i32
  }
  func.func @transform_4(%arg0: i32) -> (i32, i32) {
    %c0_i32 = arith.constant 0 : i32
    %c0_i32_0 = arith.constant 0 : i32
    %c0_i32_1 = arith.constant 0 : i32
    return %c0_i32, %c0_i32_0 : i32, i32
  }
  func.func @transform_5(%arg0: i32) -> (i32, i32) {
    %c0_i32 = arith.constant 0 : i32
    %c0_i32_0 = arith.constant 0 : i32
    %c0_i32_1 = arith.constant 0 : i32
    return %c0_i32, %c0_i32_0 : i32, i32
  }
  func.func @transform_6(%arg0: i32) -> (i32, i32, i32) {
    %c0_i32 = arith.constant 0 : i32
    %c0_i32_0 = arith.constant 0 : i32
    %c0_i32_1 = arith.constant 0 : i32
    return %arg0, %c0_i32, %c0_i32_0 : i32, i32, i32
  }
}

</mosaic_0001>

<bundles_post_ra>
// kernel: tpu_custom_call.1
= control target key start
LH: loop header
LB: loop body
LE: loop exit
PB: predicated region body
PF: predicated region fallthrough
CT: control target
= control target key end

     0   :  { %s2833_s0 = inlined_call_operand.<no memory space> [shape: f32[1], index: 0, kind: input, shape index: {}]   ;;  %s2834_s1 = inlined_call_operand.hbm [shape: bf16[8,8,256], index: 1, kind: input, shape index: {}]   ;;  %s2835_s2 = inlined_call_operand.hbm [shape: bf16[512,256], index: 2, kind: input, shape index: {}]   ;;  %s2836_s3 = inlined_call_operand.vmem [shape: f32[1,256], index: 3, kind: input, shape index: {}]   ;;  %s2837_s4 = inlined_call_operand.hbm [shape: bf16[256,256], index: 4, kind: input, shape index: {}]   ;;  %s2838_s5 = inlined_call_operand.vmem [shape: f32[1,256], index: 5, kind: input, shape index: {}]   ;;  %s2839_s6 = inlined_call_operand.hbm [shape: f32[8,8,256], index: 6, kind: output, shape index: {}]  }
   0x1   :  { %11 = sst [smem:[#allocation2]] %s2833_s0 }
   0x2   :  { %12 = vsyncpa [#allocation4], 0 }
   0x3   :  { %14 = vsyncpa [#allocation4 + $0x1], 0 }
   0x4   :  { %15 = vsyncpa [#allocation7], 0 }
   0x5   :  { %16 = vsyncpa [#allocation5], 0 }
   0x6   :  { %18 = vsyncpa [#allocation5 + $0x1], 0  ;;  %s2387_s23 = smov 0   ;;  %s2389_s24 = smov 0  }
   0x7   :  { %s2391_s25 = smov 0   ;;  %s2393_s26 = smov 0  }
   0x8 LB: > { %s2408_s0 = sadd.s32 4294967295, %s2338_s26   ;;  %s1742_s27 = sadd.s32 4294967294, %s2338_s26   ;;  %s2338_s26 = sphi %s2393_s26, %s2859_s26   ;;  %s2334_s25 = sphi %s2391_s25, %s2858_s25   ;;  %s2330_s24 = sphi %s2389_s24, %s2857_s24   ;;  %s2326_s23 = sphi %s2387_s23, %s2856_s23  }
   0x9   : > { %p65_p0 = scmp.ne.s32.totalorder %s2330_s24, %s2326_s23  ;;  %p2840_p1 = scmp.eq.s32.totalorder %s2408_s0, 0 }
   0xa   : > { %p179_p3 = scmp.eq.s32.totalorder %s1742_s27, 1  ;;  %p1743_p5 = scmp.ge.s32.totalorder %s2338_s26, 1 }
   0xb   : > { %p2417_p4 = por %p2840_p1, %p65_p0  ;;  %p186_p7 = scmp.lt.s32.totalorder %s2338_s26, 3 }
   0xc   : > { %p2422_p6 = por %p179_p3, %p65_p0  ;;  %s2340_s7 = smov [#allocation6]  }
   0xd   : > { %s2843_s28 = scalar_select %p2417_p4, 1, 0 }
   0xe   : > { %s2844_s29 = scalar_select %p2422_p6, 1, 0 }
   0xf   : > { %p2427_p8 = pnand %p1743_p5, %p186_p7  ;;  %s201_s8 = sshll.u32 %s2340_s7, 4  ;;  %s2431_s8 = int_to_ptr.vmem [resolvable:$true] %s201_s8 }
  0x10   : > { %s2341_s10 = smov [#allocation8]   ;;  %s2182_s14 = scalar_lea.hbm %s2835_s2, 8192 }
  0x11   : > { %p1918_p9 = pneg %p2427_p8  ;;  %s217_s11 = sshll.u32 %s2341_s10, 4  ;;  %s2442_s11 = int_to_ptr.vmem [resolvable:$true] %s217_s11 }
  0x12   : > { %p2183_p12 = scmp.ne.s32.totalorder %s2835_s2, %s2182_s14  ;;  %p2189_p5 = scmp.lt.u32.totalorder %s2182_s14, %s2835_s2 }
  0x13   : > { %p2438_p11 = pnand %p1918_p9, %p2840_p1 }
  0x15   : > { %p2184_p13 = pneg %p2438_p11 }
  0x17   : > { %p2185_p0 = pnand %p2184_p13, %p2183_p12 }
  0x19   : > { %p2186_p3 = pneg %p2185_p0 }
  0x1b   : > { %p2191_p7 = pnand %p2189_p5, %p2186_p3 }
  0x1d   : > { %2194 = shalt.err (!%p2191_p7)
}
  0x1e   : > { %s2195_s19 = scalar_lea.vmem %s2431_s8, 8192  ;;  %p2203_p2 = scmp.lt.s32.totalorder %s2431_s8, %s2431_s8 }
  0x1f   : > { %p2196_p9 = scmp.ne.s32.totalorder %s2431_s8, %s2195_s19  ;;  %p2204_p12 = scmp.lt.s32.totalorder %s2195_s19, %s2195_s19 }
  0x21   : > { %p2198_p10 = pnand %p2196_p9, %p2184_p13  ;;  %p2205_p0 = por %p2204_p12, %p2203_p2 }
  0x23   : > { %p2199_p1 = pneg %p2198_p10 }
  0x25   : > { %p2206_p6 = pnand %p2205_p0, %p2199_p1 }
  0x27   : > { %2209 = shalt.err (!%p2206_p6)
}
  0x28   : > { %s2342_s20 = smov 128   ;;  %s2343_s21 = smov 8  }
  0x29   : > { %1921 = dma.hbm_to_vmem [thread:$0]  (!%p2438_p11), %s2835_s2, 8192, %s2431_s8, [#allocation7], %s2342_s20, %s2342_s20, %s2343_s21  }
  0x2a   : > { %s2210_s12 = scalar_lea.hbm %s2837_s4, 4096 }
  0x2b   : > { %p2211_p1 = scmp.ne.s32.totalorder %s2837_s4, %s2210_s12  ;;  %p2217_p10 = scmp.lt.u32.totalorder %s2210_s12, %s2837_s4 }
  0x2d   : > { %p2213_p2 = pnand %p2211_p1, %p2184_p13 }
  0x2f   : > { %p2214_p6 = pneg %p2213_p2 }
  0x31   : > { %p2219_p3 = pnand %p2217_p10, %p2214_p6 }
  0x33   : > { %2222 = shalt.err (!%p2219_p3)
}
  0x34   : > { %s2223_s8 = scalar_lea.vmem %s2442_s11, 4096  ;;  %p2231_p12 = scmp.lt.s32.totalorder %s2442_s11, %s2442_s11 }
  0x35   : > { %p2224_p5 = scmp.ne.s32.totalorder %s2442_s11, %s2223_s8  ;;  %p2232_p0 = scmp.lt.s32.totalorder %s2223_s8, %s2223_s8 }
  0x37   : > { %p2226_p7 = pnand %p2224_p5, %p2184_p13  ;;  %p2233_p1 = por %p2232_p0, %p2231_p12 }
  0x39   : > { %p2227_p9 = pneg %p2226_p7 }
  0x3b   : > { %p2234_p2 = pnand %p2233_p1, %p2227_p9 }
  0x3d   : > { %2237 = shalt.err (!%p2234_p2)
}
  0x3e   : > { %1924 = dma.hbm_to_vmem [thread:$0]  (!%p2438_p11), %s2837_s4, 4096, %s2442_s11, [#allocation7], %s2342_s20, %s2342_s20, %s2343_s21  }
  0x3f   : > { %s2503_s9 = sadd.s32 1, %s2338_s26   ;;  %s52_s19 = sadd.s32 1, %s2334_s25 }
  0x40   : > { %s49_s22 = ssub.s32 %s2338_s26, %s2503_s9  ;;  %p59_p13 = scmp.ne.s32.totalorder %s2334_s25, %s2330_s24 }
  0x41   : > { %p50_p6 = scmp.eq.s32.totalorder %s49_s22, 0  ;;  %p60_p10 = scmp.eq.s32.totalorder %s2338_s26, 0 }
  0x42   : > { %p2847_p3 = scmp.eq.s32.totalorder %s2408_s0, 1  ;;  %p1935_p7 = scmp.lt.s32.totalorder %s2338_s26, 2 }
  0x43   : > { %s2519_s7 = scalar_select %p50_p6, %s2334_s25, %s52_s19  }
  0x44   : > { %p2513_p5 = por %p2847_p3, %p59_p13  ;;  %p61_p9 = por %p60_p10, %p59_p13 }
  0x45   : > { %s234_s10 = sand.u32 1, %s2334_s25   ;;  %s1887_s11 = sshll.u32 %s2338_s26, 9 }
  0x46   : > { %s2848_s27 = scalar_select %p2513_p5, 1, 0 }
  0x47   : > { %s1747_s12 = sshll.u32 %s234_s10, 5  ;;  %s2526_s15 = scalar_lea.hbm %s2834_s1, %s1887_s11 }
  0x48   : > { %s238_s16 = scalar_lea.vmem [#allocation3], %s1747_s12  ;;  %p2530_p11 = pnand %p1935_p7, %p61_p9 }
  0x49   : > { %s246_s8 = sshll.u32 %s238_s16, 4  ;;  %s2534_s18 = scalar_lea.sflag [#allocation4], %s234_s10  ;;  %s2528_s8 = int_to_ptr.vmem [resolvable:$true] %s246_s8 }
  0x4a   : > { %s2238_s19 = scalar_lea.hbm %s2526_s15, 512  ;;  %p2240_p0 = pneg %p2530_p11 }
  0x4b   : > { %p2239_p12 = scmp.ne.s32.totalorder %s2526_s15, %s2238_s19  ;;  %s2243_s11 = scalar_lea.hbm %s2834_s1, 1024 }
  0x4c   : > { %p2244_p13 = scmp.lt.u32.totalorder %s2526_s15, %s2834_s1  ;;  %p2245_p6 = scmp.lt.u32.totalorder %s2243_s11, %s2238_s19 }
  0x4d   : > { %p2241_p1 = pnand %p2240_p0, %p2239_p12  ;;  %p2247_p3 = scmp.lt.u32.totalorder %s2238_s19, %s2526_s15 }
  0x4e   : > { %p2246_p10 = por %p2245_p6, %p2244_p13 }
  0x4f   : > { %p2242_p2 = pneg %p2241_p1 }
  0x50   : > { %p2248_p7 = por %p2247_p3, %p2246_p10 }
  0x52   : > { %p2249_p9 = pnand %p2248_p7, %p2242_p2 }
  0x54   : > { %2252 = shalt.err (!%p2249_p9)
}
  0x55   : > { %s2253_s10 = scalar_lea.vmem %s2528_s8, 512  ;;  %s2344_s16 = smov [#allocation3]  }
  0x56   : > { %p2254_p12 = scmp.ne.s32.totalorder %s2528_s8, %s2253_s10  ;;  %s2258_s22 = sshll.u32 %s2344_s16, 4  ;;  %s2259_s22 = int_to_ptr.vmem [resolvable:$false] %s2258_s22 }
  0x57   : > { %s2260_s12 = scalar_lea.vmem %s2259_s22, 1024  ;;  %p2261_p4 = scmp.lt.s32.totalorder %s2528_s8, %s2259_s22 }
  0x58   : > { %p2256_p1 = pnand %p2254_p12, %p2240_p0  ;;  %p2262_p13 = scmp.lt.s32.totalorder %s2260_s12, %s2253_s10 }
  0x5a   : > { %p2257_p5 = pneg %p2256_p1  ;;  %p2263_p6 = por %p2262_p13, %p2261_p4 }
  0x5c   : > { %p2264_p10 = pnand %p2263_p6, %p2257_p5 }
  0x5e   : > { %2267 = shalt.err (!%p2264_p10)
}
  0x5f   : > { %1928 = dma.hbm_to_vmem [thread:$0]  (!%p2530_p11), %s2526_s15, 512, %s2528_s8, %s2534_s18, %s2342_s20, %s2342_s20, %s2343_s21  }
  0x60   : > { %258 = sbr.rel (%p2427_p8) target bundleno = 1377 (0x561), region = 44  ;;  %s2568_s19 = sand.u32 (!%p2427_p8), 1, %s2330_s24  }
  0x61   : > { %s1752_s11 = sshll.u32 (!%p2427_p8), %s2568_s19, 5  ;;  %s261_s13 = scalar_lea.sflag (!%p2427_p8), [#allocation4], %s2568_s19 }
  0x62   : > { %s264_s14 = scalar_lea.vmem (!%p2427_p8), [#allocation3], %s1752_s11  ;;  %p2850_p4 = scmp.ne.s32.totalorder (!%p2427_p8), %s2843_s28, 0 }
  0x67   : > { %2313 = dma.done.wait (%p2850_p4), %s261_s13, 512  }
  0x68   : > { %2315 = vsyncadd (%p2850_p4), %s261_s13, 4294966784  ;;  %p2851_p5 = scmp.eq.s32.totalorder %s2408_s0, 0 }
  0x6a   : > { %2317 = dma.done.wait (%p2851_p5), [#allocation7], 12288   ;;  %p2852_p11 = pmov %p2851_p5 }
  0x6b   : > { %v2580_v0 = vld [vmem:[%s264_s14] sm:$0xff]  ;;  %v2582_v1 = vld [vmem:[%s264_s14 + $0x8] sm:$0xff]  ;;  %v2599_v5 = vld [vmem:[%s264_s14 + $0x10] sm:$0xff]  ;;  %vm508_vm0 = vcmask 64512   ;;  %vm560_vm1 = vcmask 1043456   ;;  %v2345_v57 = vmov 0  }
  0x6c   : > { %2319 = vsyncadd (%p2852_p11), [#allocation7], 4294955008  ;;  %v2586_v2 = vcombine.high %v2580_v0, %v2580_v0  ;;  %v2590_v3 = vcombine.low %v2580_v0, %v2580_v0  ;;  %v2594_v4 = vcombine.high %v2582_v1, %v2582_v1  ;;  %v2604_v6 = vcombine.low %v2582_v1, %v2582_v1  ;;  %v2613_v8 = vld [vmem:[%s264_s14 + $0x18] sm:$0xff]  ;;  %v1986_v58 = vld [vmem:[#allocation6 + $0x4] ss:$8 sps:$4 sm:$0xff]   ;;  %s758_s28 = sld [smem:[#allocation2]] }
  0x6d   : > { %v2608_v7 = vcombine.high %v2599_v5, %v2599_v5  ;;  %v2618_v9 = vcombine.low %v2599_v5, %v2599_v5  ;;  %v2622_v10 = vcombine.high %v2613_v8, %v2613_v8  ;;  %v2630_v11 = vcombine.low %v2613_v8, %v2613_v8  ;;  %v1988_v59 = vld [vmem:[#allocation6] ss:$8 sps:$4 sm:$0xff]   ;;  %v1989_v60 = vld [vmem:[#allocation6 + $0x14] ss:$8 sps:$4 sm:$0xff]   ;;  %1180 = vmatprep.subr.bf16.mxu0 %v1986_v58  ;;  %v1991_v62 = vld [vmem:[#allocation6 + $0x10] ss:$8 sps:$4 sm:$0xff]  }
  0x6e   : > { %323 = vmatprep.subr.bf16.mxu1 %v2586_v2  ;;  %355 = vmatprep.mubr.bf16.mxu1 %v2586_v2  ;;  %v562_v56 = vsel %vm560_vm1, %v2590_v3, 0  ;;  %v1773_v61 = vcombine.high %v2580_v0, %v2582_v1  ;;  %v1992_v63 = vld [vmem:[#allocation6 + $0x24] ss:$8 sps:$4 sm:$0xff]   ;;  %v2057_v58 = vld [vmem:[#allocation6 + $0x170] ss:$8 sps:$4 sm:$0xff]   ;;  %s1755_s8 = sshll.u32 %s2568_s19, 6 }
  0x6f   : > { %324 = vmatpush1.bf16.xpose.msra.mxu1 %v2590_v3  ;;  %1181 = vmatpush1.bf16.msra.mxu0 %v1988_v59  ;;  %v2062_v59 = vld [vmem:[#allocation6 + $0x184] ss:$8 sps:$4 sm:$0xff]   ;;  %s300_s17 = scalar_lea.vmem [#allocation9], %s1755_s8  ;;  %s1889_s10 = sshll.u32 %s2408_s0, 10 }
  0x70   : > { %370 = vmatprep.subr.bf16.mxu1 %v2594_v4  ;;  %1212 = vmatprep.mubr.bf16.mxu0 %v1773_v61  ;;  %s1650_s18 = sshll.u32 %s300_s17, 4  ;;  %s2789_s12 = scalar_lea.hbm %s2839_s6, %s1889_s10  ;;  %s2784_s18 = int_to_ptr.vmem [resolvable:$true] %s1650_s18 }
  0x71   : > { %1182 = vmatprep.subr.bf16.mxu0 %v1989_v60  ;;  %v2060_v60 = vld [vmem:[#allocation6 + $0x180] ss:$8 sps:$4 sm:$0xff]   ;;  %s1636_s0 = scalar_lea.sflag [#allocation5], %s2568_s19  ;;  %s2268_s11 = scalar_lea.vmem %s2784_s18, 1024 }
  0x72   : > { %p2269_p8 = scmp.ne.s32.totalorder %s2784_s18, %s2268_s11  ;;  %p2853_p0 = scmp.ne.s32.totalorder %s2848_s27, 0 }
  0x73   : > { %1183 = vmatpush1.bf16.msra.mxu0 %v1991_v62  ;;  %v2065_v62 = vld [vmem:[#allocation6 + $0x194] ss:$8 sps:$4 sm:$0xff]   ;;  %s2346_s13 = smov [#allocation9]  }
  0x74   : > { %1184 = vmatprep.subr.bf16.mxu0 %v1992_v63  ;;  %p2270_p2 = pnand %p2269_p8, %p2853_p0  ;;  %s2272_s14 = sshll.u32 %s2346_s13, 4  ;;  %s2273_s14 = int_to_ptr.vmem [resolvable:$false] %s2272_s14 }
  0x75   : > { %p2275_p7 = scmp.lt.s32.totalorder %s2784_s18, %s2273_s14 }
  0x76   : > { %356 = vmatmul.mubr.bf16.vlgmr.msra.gmra.mrb[0].mxu1 %v2590_v3  ;;  %v1995_v3 = vld [vmem:[#allocation6 + $0x34] ss:$8 sps:$4 sm:$0xff]   ;;  %p2271_p3 = pneg %p2270_p2 }
  0x77   : > { %371 = vmatpush1.bf16.xpose.msra.mxu1 %v2604_v6  ;;  %402 = vmatprep.mubr.bf16.mxu1 %v2594_v4 }
  0x78   : > { %417 = vmatprep.subr.bf16.mxu1 %v2608_v7 }
  0x7e   : > { %403 = vmatmul.mubr.bf16.vlgmr.msra.gmra.mrb[4].mxu1 %v2604_v6 }
  0x7f   : > { %418 = vmatpush1.bf16.xpose.msra.mxu1 %v2618_v9  ;;  %449 = vmatprep.mubr.bf16.mxu1 %v2608_v7 }
  0x80   : > { %464 = vmatprep.subr.bf16.mxu1 %v2622_v10 }
  0x86   : > { %450 = vmatmul.mubr.bf16.vlgmr.msra.gmra.mrb[8].mxu1 %v2618_v9 }
  0x87   : > { %465 = vmatpush1.bf16.xpose.msra.mxu1 %v2630_v11  ;;  %496 = vmatprep.mubr.bf16.mxu1 %v2622_v10 }
  0x88   : > { %1764 = vmatprep.subr.msk.bf16.mxu1 %vm560_vm1, %v2586_v2  ;;  %v1994_v2 = vld [vmem:[#allocation6 + $0x20] ss:$8 sps:$4 sm:$0xff]  }
  0x89   : > { %1185 = vmatpush1.bf16.msra.mxu0 %v1994_v2  ;;  %v2063_v2 = vld [vmem:[#allocation6 + $0x190] ss:$8 sps:$4 sm:$0xff]  }
  0x8a   : > { %1186 = vmatprep.subr.bf16.mxu0 %v1995_v3 }
  0x8e   : > { %497 = vmatmul.mubr.bf16.vlgmr.msra.gmra.mrb[12].mxu1 %v2630_v11 }
  0x8f   : > { %568 = vmatpush1.bf16.msra.mxu1 %v562_v56  ;;  %599 = vmatprep.mubr.bf16.mxu1 %v2345_v57  ;;  %v2059_v56 = vld [vmem:[#allocation6 + $0x174] ss:$8 sps:$4 sm:$0xff]  }
  0x90   : > { %1766 = vmatprep.subr.msk.bf16.mxu1 %vm560_vm1, %v2594_v4  ;;  %v1997_v4 = vld [vmem:[#allocation6 + $0x30] ss:$8 sps:$4 sm:$0xff]  }
  0x91   : > { %1187 = vmatpush1.bf16.msra.mxu0 %v1997_v4  ;;  %v2068_v4 = vld [vmem:[#allocation6 + $0x1a4] ss:$8 sps:$4 sm:$0xff]  }
 0x149   : > { %v357_v12 = vpop.f32.mrb[0].mxu1 }
 0x14a   : > { %v504_v13 = vmul.f32 0.0625, %v357_v12  ;;  %v359_v14 = vpop.f32.mrb[1].mxu1  ;;  %v1998_v12 = vld [vmem:[#allocation6 + $0x44] ss:$8 sps:$4 sm:$0xff]  }
 0x14b   : > { %v360_v15 = vpop.f32.mrb[2].mxu1  ;;  %1188 = vmatprep.subr.bf16.mxu0 %v1998_v12  ;;  %v2001_v14 = vld [vmem:[#allocation6 + $0x54] ss:$8 sps:$4 sm:$0xff]  }
 0x14c   : > { %v361_v16 = vpop.f32.mrb[3].mxu1  ;;  %v509_v17 = vsel %vm508_vm0, %v504_v13, -inf  ;;  %v2003_v15 = vld [vmem:[#allocation6 + $0x50] ss:$8 sps:$4 sm:$0xff]  }
 0x14d   : > { %510 = vmax.xlane.f32.xlu0 %v509_v17  ;;  %v2004_v16 = vld [vmem:[#allocation6 + $0x64] ss:$8 sps:$4 sm:$0xff]   ;;  %v2006_v17 = vld [vmem:[#allocation6 + $0x60] ss:$8 sps:$4 sm:$0xff]  }
 0x151   : > { %v404_v18 = vpop.f32.mrb[4].mxu1 }
 0x152   : > { %v505_v19 = vmul.f32 0.0625, %v404_v18  ;;  %v406_v20 = vpop.f32.mrb[5].mxu1  ;;  %v2007_v18 = vld [vmem:[#allocation6 + $0x74] ss:$8 sps:$4 sm:$0xff]  }
 0x153   : > { %v407_v21 = vpop.f32.mrb[6].mxu1  ;;  %v2010_v20 = vld [vmem:[#allocation6 + $0x84] ss:$8 sps:$4 sm:$0xff]  }
 0x154   : > { %v408_v22 = vpop.f32.mrb[7].mxu1  ;;  %v512_v23 = vsel %vm508_vm0, %v505_v19, -inf  ;;  %v2012_v21 = vld [vmem:[#allocation6 + $0x80] ss:$8 sps:$4 sm:$0xff]  }
 0x155   : > { %513 = vmax.xlane.f32.xlu0 %v512_v23  ;;  %v2013_v22 = vld [vmem:[#allocation6 + $0x94] ss:$8 sps:$4 sm:$0xff]   ;;  %v2015_v23 = vld [vmem:[#allocation6 + $0x90] ss:$8 sps:$4 sm:$0xff]  }
 0x159   : > { %v451_v24 = vpop.f32.mrb[8].mxu1 }
 0x15a   : > { %v506_v25 = vmul.f32 0.0625, %v451_v24  ;;  %v453_v26 = vpop.f32.mrb[9].mxu1  ;;  %v2016_v24 = vld [vmem:[#allocation6 + $0xa4] ss:$8 sps:$4 sm:$0xff]  }
 0x15b   : > { %v454_v27 = vpop.f32.mrb[10].mxu1  ;;  %v2019_v26 = vld [vmem:[#allocation6 + $0xb4] ss:$8 sps:$4 sm:$0xff]  }
 0x15c   : > { %v455_v28 = vpop.f32.mrb[11].mxu1  ;;  %v515_v29 = vsel %vm508_vm0, %v506_v25, -inf  ;;  %v2021_v27 = vld [vmem:[#allocation6 + $0xb0] ss:$8 sps:$4 sm:$0xff]  }
 0x15d   : > { %516 = vmax.xlane.f32.xlu1 %v515_v29  ;;  %v2022_v28 = vld [vmem:[#allocation6 + $0xc4] ss:$8 sps:$4 sm:$0xff]   ;;  %v2024_v29 = vld [vmem:[#allocation6 + $0xc0] ss:$8 sps:$4 sm:$0xff]  }
 0x161   : > { %v498_v30 = vpop.f32.mrb[12].mxu1 }
 0x162   : > { %v507_v31 = vmul.f32 0.0625, %v498_v30  ;;  %v500_v32 = vpop.f32.mrb[13].mxu1  ;;  %v2025_v30 = vld [vmem:[#allocation6 + $0xd4] ss:$8 sps:$4 sm:$0xff]  }
 0x163   : > { %v501_v33 = vpop.f32.mrb[14].mxu1  ;;  %v2028_v32 = vld [vmem:[#allocation6 + $0xe4] ss:$8 sps:$4 sm:$0xff]  }
 0x164   : > { %v502_v34 = vpop.f32.mrb[15].mxu1  ;;  %v518_v35 = vsel %vm508_vm0, %v507_v31, -inf  ;;  %v2030_v33 = vld [vmem:[#allocation6 + $0xe0] ss:$8 sps:$4 sm:$0xff]  }
 0x165   : > { %519 = vmax.xlane.f32.xlu1 %v518_v35  ;;  %v2031_v34 = vld [vmem:[#allocation6 + $0xf4] ss:$8 sps:$4 sm:$0xff]   ;;  %v2033_v35 = vld [vmem:[#allocation6 + $0xf0] ss:$8 sps:$4 sm:$0xff]  }
 0x1da   : > { %v511_v36 = vpop.xlane.xlu0 %510 }
 0x1db   : > { %v521_v37 = vsub.f32 %v504_v13, %v511_v36  ;;  %v2000_v13 = vld [vmem:[#allocation6 + $0x40] ss:$8 sps:$4 sm:$0xff]   ;;  %v2037_v36 = vld [vmem:[#allocation6 + $0x104] ss:$8 sps:$4 sm:$0xff]  }
 0x1dc   : > { %1189 = vmatpush1.bf16.msra.mxu0 %v2000_v13  ;;  %v612_v13 = vsel %vm560_vm1, %v2604_v6, 0 }
 0x1dd   : > { %v525_v38 = vmul.f32 1.442695, %v521_v37  ;;  %1190 = vmatprep.subr.bf16.mxu0 %v2001_v14  ;;  %v1772_v37 = vcombine.low %v2580_v0, %v2582_v1  ;;  %v2066_v14 = vld [vmem:[#allocation6 + $0x1a0] ss:$8 sps:$4 sm:$0xff]  }
 0x1df   : > { %2134 = vpow2.f32 %v525_v38  ;;  %v2035_v38 = vld [vmem:[#allocation6 + $0x100] ss:$8 sps:$4 sm:$0xff]  }
 0x1e0   : > { %1191 = vmatpush1.bf16.msra.mxu0 %v2003_v15 }
 0x1e1   : > { %1192 = vmatprep.subr.bf16.mxu0 %v2004_v16  ;;  %v2071_v16 = vld [vmem:[#allocation6 + $0x1b4] ss:$8 sps:$4 sm:$0xff]  }
 0x1e2   : > { %v514_v39 = vpop.xlane.xlu0 %513 }
 0x1e3   : > { %v522_v40 = vsub.f32 %v505_v19, %v514_v39  ;;  %v2009_v19 = vld [vmem:[#allocation6 + $0x70] ss:$8 sps:$4 sm:$0xff]   ;;  %v2041_v39 = vld [vmem:[#allocation6 + $0x114] ss:$8 sps:$4 sm:$0xff]  }
 0x1e4   : > { %1193 = vmatpush1.bf16.msra.mxu0 %v2006_v17  ;;  %v2069_v17 = vld [vmem:[#allocation6 + $0x1b0] ss:$8 sps:$4 sm:$0xff]  }
 0x1e5   : > { %v527_v41 = vmul.f32 1.442695, %v522_v40  ;;  %1194 = vmatprep.subr.bf16.mxu0 %v2007_v18  ;;  %v2039_v40 = vld [vmem:[#allocation6 + $0x110] ss:$8 sps:$4 sm:$0xff]  }
 0x1e7   : > { %2136 = vpow2.f32 %v527_v41  ;;  %v2044_v41 = vld [vmem:[#allocation6 + $0x124] ss:$8 sps:$4 sm:$0xff]  }
 0x1e8   : > { %1195 = vmatpush1.bf16.msra.mxu0 %v2009_v19  ;;  %v662_v19 = vsel %vm560_vm1, %v2618_v9, 0 }
 0x1e9   : > { %v2640_v42 = vpop.eup %2134  ;;  %1196 = vmatprep.subr.bf16.mxu0 %v2010_v20 }
 0x1ea   : > { %v517_v43 = vpop.xlane.xlu1 %516  ;;  %v533_v44 = vsel %vm508_vm0, %v2640_v42, 0.0 }
 0x1eb   : > { %v523_v45 = vsub.f32 %v506_v25, %v517_v43  ;;  %534 = vadd.xlane.f32.xlu0 %v533_v44  ;;  %v2018_v25 = vld [vmem:[#allocation6 + $0xa0] ss:$8 sps:$4 sm:$0xff]   ;;  %v2047_v44 = vld [vmem:[#allocation6 + $0x134] ss:$8 sps:$4 sm:$0xff]  }
 0x1ec   : > { %1197 = vmatpush1.bf16.msra.mxu0 %v2012_v21  ;;  %v2042_v43 = vld [vmem:[#allocation6 + $0x120] ss:$8 sps:$4 sm:$0xff]  }
 0x1ed   : > { %v529_v46 = vmul.f32 1.442695, %v523_v45  ;;  %1198 = vmatprep.subr.bf16.mxu0 %v2013_v22  ;;  %v2045_v45 = vld [vmem:[#allocation6 + $0x130] ss:$8 sps:$4 sm:$0xff]   ;;  %v712_v22 = vsel %vm560_vm1, %v2630_v11, 0  ;;  %v1775_v11 = vcombine.high %v2599_v5, %v2613_v8 }
 0x1ef   : > { %2138 = vpow2.f32 %v529_v46  ;;  %v2050_v46 = vld [vmem:[#allocation6 + $0x144] ss:$8 sps:$4 sm:$0xff]  }
 0x1f0   : > { %1199 = vmatpush1.bf16.msra.mxu0 %v2015_v23 }
 0x1f1   : > { %v2644_v47 = vpop.eup %2136  ;;  %1200 = vmatprep.subr.bf16.mxu0 %v2016_v24 }
 0x1f2   : > { %v520_v48 = vpop.xlane.xlu1 %519  ;;  %v536_v49 = vsel %vm508_vm0, %v2644_v47, 0.0 }
 0x1f3   : > { %v524_v50 = vsub.f32 %v507_v31, %v520_v48  ;;  %537 = vadd.xlane.f32.xlu1 %v536_v49  ;;  %v2027_v31 = vld [vmem:[#allocation6 + $0xd0] ss:$8 sps:$4 sm:$0xff]   ;;  %v2048_v48 = vld [vmem:[#allocation6 + $0x140] ss:$8 sps:$4 sm:$0xff]   ;;  %v2053_v49 = vld [vmem:[#allocation6 + $0x154] ss:$8 sps:$4 sm:$0xff]  }
 0x1f4   : > { %1201 = vmatpush1.bf16.msra.mxu0 %v2018_v25  ;;  %v2074_v25 = vld [vmem:[#allocation6 + $0x1c4] ss:$8 sps:$4 sm:$0xff]  }
 0x1f5   : > { %v531_v51 = vmul.f32 1.442695, %v524_v50  ;;  %1202 = vmatprep.subr.bf16.mxu0 %v2019_v26  ;;  %v2051_v50 = vld [vmem:[#allocation6 + $0x150] ss:$8 sps:$4 sm:$0xff]  }
 0x1f6   : > { %v2075_v26 = vld [vmem:[#allocation6 + $0x1d0] ss:$8 sps:$4 sm:$0xff]  }
 0x1f7   : > { %2140 = vpow2.f32 %v531_v51  ;;  %v2056_v51 = vld [vmem:[#allocation6 + $0x164] ss:$8 sps:$4 sm:$0xff]  }
 0x1f8   : > { %1203 = vmatpush1.bf16.msra.mxu0 %v2021_v27  ;;  %v2082_v27 = vld [vmem:[#allocation6 + $0x1e4] ss:$8 sps:$4 sm:$0xff]  }
 0x1f9   : > { %v2648_v52 = vpop.eup %2138  ;;  %1204 = vmatprep.subr.bf16.mxu0 %v2022_v28  ;;  %v2085_v28 = vld [vmem:[#allocation6 + $0x1f4] ss:$8 sps:$4 sm:$0xff]  }
 0x1fa   : > { %v539_v53 = vsel %vm508_vm0, %v2648_v52, 0.0 }
 0x1fb   : > { %540 = vadd.xlane.f32.xlu0 %v539_v53  ;;  %v2054_v53 = vld [vmem:[#allocation6 + $0x160] ss:$8 sps:$4 sm:$0xff]  }
 0x1fc   : > { %1205 = vmatpush1.bf16.msra.mxu0 %v2024_v29  ;;  %v2083_v29 = vld [vmem:[#allocation6 + $0x1f0] ss:$8 sps:$4 sm:$0xff]  }
 0x1fd   : > { %1206 = vmatprep.subr.bf16.mxu0 %v2025_v30  ;;  %v2086_v30 = vld [vmem:[#allocation8] ss:$8 sps:$4 sm:$0xff]  }
 0x200   : > { %1207 = vmatpush1.bf16.msra.mxu0 %v2027_v31  ;;  %v2088_v31 = vld [vmem:[#allocation8 + $0x4] ss:$8 sps:$4 sm:$0xff]  }
 0x201   : > { %v2652_v54 = vpop.eup %2140  ;;  %1208 = vmatprep.subr.bf16.mxu0 %v2028_v32  ;;  %v2091_v32 = vld [vmem:[#allocation8 + $0x14] ss:$8 sps:$4 sm:$0xff]  }
 0x202   : > { %v542_v55 = vsel %vm508_vm0, %v2652_v54, 0.0 }
 0x203   : > { %543 = vadd.xlane.f32.xlu1 %v542_v55 }
 0x204   : > { %1209 = vmatpush1.bf16.msra.mxu0 %v2030_v33  ;;  %v2089_v33 = vld [vmem:[#allocation8 + $0x10] ss:$8 sps:$4 sm:$0xff]  }
 0x205   : > { %1210 = vmatprep.subr.bf16.mxu0 %v2031_v34  ;;  %v2094_v34 = vld [vmem:[#allocation8 + $0x24] ss:$8 sps:$4 sm:$0xff]  }
 0x208   : > { %1211 = vmatpush1.bf16.msra.mxu0 %v2033_v35  ;;  %v2092_v35 = vld [vmem:[#allocation8 + $0x20] ss:$8 sps:$4 sm:$0xff]  }
 0x209   : > { %1233 = vmatprep.subr.bf16.mxu0 %v2037_v36  ;;  %v2097_v36 = vld [vmem:[#allocation8 + $0x34] ss:$8 sps:$4 sm:$0xff]  }
 0x20b   : > { %1213 = vmatmul.mubr.bf16.vlgmr.msra.gmra.mrb[0].mxu0 %v1772_v37  ;;  %v2095_v37 = vld [vmem:[#allocation8 + $0x30] ss:$8 sps:$4 sm:$0xff]  }
 0x20c   : > { %1234 = vmatpush1.bf16.msra.mxu0 %v2035_v38  ;;  %1222 = vmatprep.mubr.bf16.mxu0 %v1775_v11  ;;  %v2100_v38 = vld [vmem:[#allocation8 + $0x44] ss:$8 sps:$4 sm:$0xff]  }
 0x20d   : > { %1235 = vmatprep.subr.bf16.mxu0 %v2041_v39  ;;  %v2098_v39 = vld [vmem:[#allocation8 + $0x40] ss:$8 sps:$4 sm:$0xff]  }
 0x210   : > { %1236 = vmatpush1.bf16.msra.mxu0 %v2039_v40  ;;  %v2103_v40 = vld [vmem:[#allocation8 + $0x54] ss:$8 sps:$4 sm:$0xff]  }
 0x211   : > { %1237 = vmatprep.subr.bf16.mxu0 %v2044_v41  ;;  %v2101_v41 = vld [vmem:[#allocation8 + $0x50] ss:$8 sps:$4 sm:$0xff]  }
 0x214   : > { %1238 = vmatpush1.bf16.msra.mxu0 %v2042_v43 }
 0x215   : > { %1239 = vmatprep.subr.bf16.mxu0 %v2047_v44 }
 0x218   : > { %1240 = vmatpush1.bf16.msra.mxu0 %v2045_v45 }
 0x219   : > { %1241 = vmatprep.subr.bf16.mxu0 %v2050_v46 }
 0x21c   : > { %1242 = vmatpush1.bf16.msra.mxu0 %v2048_v48  ;;  %v759_v48 = vstv %s758_s28  ;;  %s2274_s28 = scalar_lea.vmem %s2273_s14, 2048 }
 0x21d   : > { %1243 = vmatprep.subr.bf16.mxu0 %v2053_v49  ;;  %v310_v49 = vunpack.c.l.bf16 %v2582_v1  ;;  %p2276_p9 = scmp.lt.s32.totalorder %s2274_s28, %s2268_s11 }
 0x21f   : > { %p2277_p12 = por %p2276_p9, %p2275_p7 }
 0x220   : > { %1244 = vmatpush1.bf16.msra.mxu0 %v2051_v50  ;;  %v309_v50 = vunpack.c.h.bf16 %v2580_v0 }
 0x221   : > { %1245 = vmatprep.subr.bf16.mxu0 %v2056_v51  ;;  %p2278_p1 = pnand %p2277_p12, %p2271_p3 }
 0x224   : > { %1246 = vmatpush1.bf16.msra.mxu0 %v2054_v53 }
 0x225   : > { %1247 = vmatprep.subr.bf16.mxu0 %v2059_v56  ;;  %v308_v56 = vunpack.c.l.bf16 %v2580_v0 }
 0x228   : > { %1248 = vmatpush1.bf16.msra.mxu0 %v2057_v58 }
 0x229   : > { %1249 = vmatprep.subr.bf16.mxu0 %v2062_v59 }
 0x22c   : > { %1250 = vmatpush1.bf16.msra.mxu0 %v2060_v60 }
 0x22d   : > { %1251 = vmatprep.subr.bf16.mxu0 %v2065_v62 }
 0x230   : > { %1252 = vmatpush1.bf16.msra.mxu0 %v2063_v2 }
 0x231   : > { %1253 = vmatprep.subr.bf16.mxu0 %v2068_v4 }
 0x234   : > { %1254 = vmatpush1.bf16.msra.mxu0 %v2066_v14 }
 0x235   : > { %1255 = vmatprep.subr.bf16.mxu0 %v2071_v16 }
 0x238   : > { %1256 = vmatpush1.bf16.msra.mxu0 %v2069_v17 }
 0x239   : > { %1257 = vmatprep.subr.bf16.mxu0 %v2074_v25 }
 0x278   : > { %v535_v55 = vpop.xlane.xlu0 %534 }
 0x279   : > { %2142 = vrcp.f32 %v535_v55  ;;  %v311_v55 = vunpack.c.h.bf16 %v2582_v1 }
 0x280   : > { %v538_v61 = vpop.xlane.xlu1 %537 }
 0x281   : > { %2144 = vrcp.f32 %v538_v61 }
 0x283   : > { %v2143_v63 = vpop.eup %2142 }
 0x284   : > { %v549_v3 = vmul.f32 %v2143_v63, %v2640_v42 }
 0x286   : > { %v553_v12 = vpack.c.bf16 %v549_v3, %v549_v3 }
 0x288   : > { %1765 = vmatmul.mubr.msk.bf16.vlgmr.msra.gmra.mrb[16].mxu1 %vm508_vm0, %v553_v12  ;;  %v541_v15 = vpop.xlane.xlu0 %540 }
 0x289   : > { %2146 = vrcp.f32 %v541_v15  ;;  %618 = vmatpush1.bf16.msra.mxu1 %v612_v13  ;;  %649 = vmatprep.mubr.bf16.mxu1 %v2345_v57 }
 0x28a   : > { %1768 = vmatprep.subr.msk.bf16.mxu1 %vm560_vm1, %v2608_v7 }
 0x28b   : > { %v2145_v42 = vpop.eup %2144 }
 0x28c   : > { %v550_v18 = vmul.f32 %v2145_v42, %v2644_v47 }
 0x28e   : > { %v554_v6 = vpack.c.bf16 %v550_v18, %v550_v18  ;;  %v314_v18 = vunpack.c.l.bf16 %v2613_v8 }
 0x290   : > { %1767 = vmatmul.mubr.msk.bf16.vlgmr.msra.gmra.mrb[20].mxu1 %vm508_vm0, %v554_v6  ;;  %v544_v20 = vpop.xlane.xlu1 %543  ;;  %v313_v6 = vunpack.c.h.bf16 %v2599_v5 }
 0x291   : > { %2148 = vrcp.f32 %v544_v20  ;;  %668 = vmatpush1.bf16.msra.mxu1 %v662_v19  ;;  %699 = vmatprep.mubr.bf16.mxu1 %v2345_v57 }
 0x292   : > { %1770 = vmatprep.subr.msk.bf16.mxu1 %vm560_vm1, %v2622_v10  ;;  %v2072_v10 = vld [vmem:[#allocation6 + $0x1c0] ss:$8 sps:$4 sm:$0xff]  }
 0x293   : > { %v2147_v7 = vpop.eup %2146  ;;  %1258 = vmatpush1.bf16.msra.mxu0 %v2072_v10 }
 0x294   : > { %v551_v21 = vmul.f32 %v2147_v7, %v2648_v52  ;;  %v2077_v52 = vld [vmem:[#allocation6 + $0x1d4] ss:$8 sps:$4 sm:$0xff]   ;;  %v315_v7 = vunpack.c.h.bf16 %v2613_v8 }
 0x295   : > { %1259 = vmatprep.subr.bf16.mxu0 %v2077_v52 }
 0x296   : > { %v555_v47 = vpack.c.bf16 %v551_v21, %v551_v21  ;;  %v312_v21 = vunpack.c.l.bf16 %v2599_v5 }
 0x297   : > { %1260 = vmatpush1.bf16.msra.mxu0 %v2075_v26 }
 0x298   : > { %1769 = vmatmul.mubr.msk.bf16.vlgmr.msra.gmra.mrb[24].mxu1 %vm508_vm0, %v555_v47  ;;  %1261 = vmatprep.subr.bf16.mxu0 %v2082_v27 }
 0x299   : > { %718 = vmatpush1.bf16.msra.mxu1 %v712_v22  ;;  %749 = vmatprep.mubr.bf16.mxu1 %v2345_v57  ;;  %v1774_v57 = vcombine.low %v2599_v5, %v2613_v8 }
 0x29a   : > { %1574 = vmatprep.subr.bf16.mxu1 %v2088_v31  ;;  %v2112_v31 = vld [vmem:[#allocation8 + $0x84] ss:$8 sps:$4 sm:$0xff]  }
 0x29b   : > { %v2149_v9 = vpop.eup %2148  ;;  %1223 = vmatmul.mubr.bf16.gmra.mrb[4].mxu0 %v1774_v57 }
 0x29c   : > { %v552_v23 = vmul.f32 %v2149_v9, %v2652_v54  ;;  %v2080_v54 = vld [vmem:[#allocation6 + $0x1e0] ss:$8 sps:$4 sm:$0xff]  }
 0x29d   : > { %1262 = vmatpush1.bf16.msra.mxu0 %v2080_v54  ;;  %v2106_v54 = vld [vmem:[#allocation8 + $0x64] ss:$8 sps:$4 sm:$0xff]  }
 0x29e   : > { %v556_v24 = vpack.c.bf16 %v552_v23, %v552_v23  ;;  %1263 = vmatprep.subr.bf16.mxu0 %v2085_v28  ;;  %v2104_v28 = vld [vmem:[#allocation8 + $0x60] ss:$8 sps:$4 sm:$0xff]  }
 0x2a0   : > { %1771 = vmatmul.mubr.msk.bf16.vlgmr.msra.gmra.mrb[28].mxu1 %vm508_vm0, %v556_v24 }
 0x2a1   : > { %1264 = vmatpush1.bf16.msra.mxu0 %v2083_v29  ;;  %1575 = vmatpush1.bf16.msra.mxu1 %v2086_v30  ;;  %v2109_v29 = vld [vmem:[#allocation8 + $0x74] ss:$8 sps:$4 sm:$0xff]   ;;  %v2107_v30 = vld [vmem:[#allocation8 + $0x70] ss:$8 sps:$4 sm:$0xff]  }
 0x2a2   : > { %1576 = vmatprep.subr.bf16.mxu1 %v2091_v32  ;;  %v2110_v32 = vld [vmem:[#allocation8 + $0x80] ss:$8 sps:$4 sm:$0xff]  }
 0x2a5   : > { %1577 = vmatpush1.bf16.msra.mxu1 %v2089_v33  ;;  %v2115_v33 = vld [vmem:[#allocation8 + $0x94] ss:$8 sps:$4 sm:$0xff]  }
 0x2a6   : > { %1578 = vmatprep.subr.bf16.mxu1 %v2094_v34  ;;  %v2113_v34 = vld [vmem:[#allocation8 + $0x90] ss:$8 sps:$4 sm:$0xff]  }
 0x2a9   : > { %1579 = vmatpush1.bf16.msra.mxu1 %v2092_v35  ;;  %v2118_v35 = vld [vmem:[#allocation8 + $0xa4] ss:$8 sps:$4 sm:$0xff]  }
 0x2aa   : > { %1580 = vmatprep.subr.bf16.mxu1 %v2097_v36  ;;  %v2116_v36 = vld [vmem:[#allocation8 + $0xa0] ss:$8 sps:$4 sm:$0xff]  }
 0x2ad   : > { %1581 = vmatpush1.bf16.msra.mxu1 %v2095_v37  ;;  %v2121_v37 = vld [vmem:[#allocation8 + $0xb4] ss:$8 sps:$4 sm:$0xff]  }
 0x2ae   : > { %1582 = vmatprep.subr.bf16.mxu1 %v2100_v38  ;;  %v2119_v38 = vld [vmem:[#allocation8 + $0xb0] ss:$8 sps:$4 sm:$0xff]  }
 0x2b1   : > { %1583 = vmatpush1.bf16.msra.mxu1 %v2098_v39  ;;  %v2124_v39 = vld [vmem:[#allocation8 + $0xc4] ss:$8 sps:$4 sm:$0xff]  }
 0x2b2   : > { %1584 = vmatprep.subr.bf16.mxu1 %v2103_v40  ;;  %v2122_v40 = vld [vmem:[#allocation8 + $0xc0] ss:$8 sps:$4 sm:$0xff]  }
 0x2b5   : > { %1585 = vmatpush1.bf16.msra.mxu1 %v2101_v41  ;;  %v2127_v41 = vld [vmem:[#allocation8 + $0xd4] ss:$8 sps:$4 sm:$0xff]  }
 0x2b6   : > { %1586 = vmatprep.subr.bf16.mxu1 %v2106_v54 }
 0x2b9   : > { %1587 = vmatpush1.bf16.msra.mxu1 %v2104_v28 }
 0x2ba   : > { %1588 = vmatprep.subr.bf16.mxu1 %v2109_v29 }
 0x2bd   : > { %1589 = vmatpush1.bf16.msra.mxu1 %v2107_v30 }
 0x2be   : > { %1590 = vmatprep.subr.bf16.mxu1 %v2112_v31 }
 0x2c1   : > { %1591 = vmatpush1.bf16.msra.mxu1 %v2110_v32 }
 0x2c2   : > { %1592 = vmatprep.subr.bf16.mxu1 %v2115_v33 }
 0x2c5   : > { %1593 = vmatpush1.bf16.msra.mxu1 %v2113_v34 }
 0x2c6   : > { %1594 = vmatprep.subr.bf16.mxu1 %v2118_v35 }
 0x2c9   : > { %1595 = vmatpush1.bf16.msra.mxu1 %v2116_v36 }
 0x2ca   : > { %1596 = vmatprep.subr.bf16.mxu1 %v2121_v37 }
 0x2cd   : > { %1597 = vmatpush1.bf16.msra.mxu1 %v2119_v38 }
 0x2ce   : > { %1598 = vmatprep.subr.bf16.mxu1 %v2124_v39 }
 0x2d1   : > { %1599 = vmatpush1.bf16.msra.mxu1 %v2122_v40 }
 0x2d2   : > { %1600 = vmatprep.subr.bf16.mxu1 %v2127_v41 }
 0x35b   : > { %v601_v43 = vpop.f32.mrb[16].mxu1 }
 0x35c   : > { %v603_v44 = vpop.f32.mrb[17].mxu1  ;;  %v760_v58 = vmul.f32 %v759_v48, %v601_v43  ;;  %v2125_v43 = vld [vmem:[#allocation8 + $0xd0] ss:$8 sps:$4 sm:$0xff]  }
 0x35d   : > { %v605_v45 = vpop.f32.mrb[18].mxu1  ;;  %v761_v51 = vmul.f32 %v759_v48, %v603_v44  ;;  %1601 = vmatpush1.bf16.msra.mxu1 %v2125_v43  ;;  %v2130_v44 = vld [vmem:[#allocation8 + $0xe4] ss:$8 sps:$4 sm:$0xff]  }
 0x35e   : > { %v606_v46 = vpop.f32.mrb[19].mxu1  ;;  %v2710_v12 = vadd.f32 %v760_v58, %v308_v56  ;;  %v2128_v45 = vld [vmem:[#allocation8 + $0xe0] ss:$8 sps:$4 sm:$0xff]   ;;  %1602 = vmatprep.subr.bf16.mxu1 %v2130_v44 }
 0x35f   : > { %v2702_v3 = vadd.f32 %v761_v51, %v309_v50  ;;  %v2133_v46 = vld [vmem:[#allocation8 + $0xf4] ss:$8 sps:$4 sm:$0xff]   ;;  %v850_v51 = vlaneseq }
 0x361   : > { %1603 = vmatpush1.bf16.msra.mxu1 %v2128_v45 }
 0x362   : > { %1604 = vmatprep.subr.bf16.mxu1 %v2133_v46 }
 0x363   : > { %v651_v53 = vpop.f32.mrb[20].mxu1 }
 0x364   : > { %v762_v59 = vmul.f32 %v759_v48, %v651_v53  ;;  %v653_v60 = vpop.f32.mrb[21].mxu1  ;;  %v2740_v53 = vshrl.u32 %v850_v51, 7 }
 0x365   : > { %v763_v61 = vmul.f32 %v759_v48, %v653_v60  ;;  %v655_v62 = vpop.f32.mrb[22].mxu1 }
 0x366   : > { %v2698_v63 = vadd.f32 %v762_v59, %v310_v49  ;;  %v656_v2 = vpop.f32.mrb[23].mxu1  ;;  %v852_v58 = vsub.s32 0, %v2740_v53  ;;  %v848_v59 = vld [vmem:[%s2836_s3] sm:$0x3]  ;;  %v856_v60 = vsub.s32 1, %v2740_v53 }
 0x367   : > { %v2706_v4 = vadd.f32 %v763_v61, %v311_v55 }
 0x368   : > { %v778_v14 = vpack.c.bf16 %v2698_v63, %v2710_v12  ;;  %v853_v61 = vrot.slane %v848_v59, %v852_v58  ;;  %v857_v62 = vrot.slane %v848_v59, %v856_v60 }
 0x369   : > { %v779_v13 = vpack.c.bf16 %v2706_v4, %v2702_v3 }
 0x36b   : > { %v701_v15 = vpop.f32.mrb[24].mxu1  ;;  %1265 = vmatprep.mubr.bf16.mxu0 %v779_v13 }
 0x36c   : > { %v703_v16 = vpop.f32.mrb[25].mxu1  ;;  %1266 = vmatmul.mubr.bf16.vlgmr.msra.gmra.mrb[0].mxu0 %v778_v14  ;;  %v764_v47 = vmul.f32 %v759_v48, %v701_v15 }
 0x36d   : > { %v705_v42 = vpop.f32.mrb[26].mxu1  ;;  %v765_v19 = vmul.f32 %v759_v48, %v703_v16 }
 0x36e   : > { %v706_v17 = vpop.f32.mrb[27].mxu1  ;;  %v2734_v11 = vadd.f32 %v764_v47, %v312_v21 }
 0x36f   : > { %v2726_v52 = vadd.f32 %v765_v19, %v313_v6 }
 0x373   : > { %v751_v20 = vpop.f32.mrb[28].mxu1 }
 0x374   : > { %v766_v22 = vmul.f32 %v759_v48, %v751_v20  ;;  %v753_v9 = vpop.f32.mrb[29].mxu1 }
 0x375   : > { %v767_v23 = vmul.f32 %v759_v48, %v753_v9  ;;  %v755_v24 = vpop.f32.mrb[30].mxu1  ;;  %v2131_v48 = vld [vmem:[#allocation8 + $0xf0] ss:$8 sps:$4 sm:$0xff]  }
 0x376   : > { %v2722_v25 = vadd.f32 %v766_v22, %v314_v18  ;;  %v756_v10 = vpop.f32.mrb[31].mxu1  ;;  %1605 = vmatpush1.bf16.msra.mxu1 %v2131_v48 }
 0x377   : > { %v2730_v26 = vadd.f32 %v767_v23, %v315_v7 }
 0x378   : > { %v782_v27 = vpack.c.bf16 %v2722_v25, %v2734_v11 }
 0x379   : > { %v783_v57 = vpack.c.bf16 %v2730_v26, %v2726_v52 }
 0x37b   : > { %1275 = vmatprep.mubr.bf16.mxu0 %v783_v57 }
 0x37c   : > { %1276 = vmatmul.mubr.bf16.gmra.mrb[4].mxu0 %v782_v27 }
 0x43f   : > { %v1267_v2 = vpop.f32.mrb[0].mxu0 }
 0x440   : > { %v1890_v13 = vadd.f32 %v1267_v2, %v853_v61  ;;  %v1269_v14 = vpop.f32.mrb[1].mxu0 }
 0x441   : > { %v1891_v15 = vadd.f32 %v1269_v14, %v857_v62  ;;  %v1271_v16 = vpop.f32.mrb[2].mxu0 }
 0x442   : > { %v1840_v42 = vmul.f32 -1.442695, %v1890_v13  ;;  %v1892_v17 = vadd.f32 %v1271_v16, %v853_v61  ;;  %v1273_v19 = vpop.f32.mrb[3].mxu0 }
 0x443   : > { %v1841_v20 = vmul.f32 -1.442695, %v1891_v15  ;;  %v1893_v47 = vadd.f32 %v1273_v19, %v857_v62 }
 0x444   : > { %2150 = vpow2.f32 %v1840_v42  ;;  %v1842_v22 = vmul.f32 -1.442695, %v1892_v17 }
 0x445   : > { %2152 = vpow2.f32 %v1841_v20  ;;  %v1843_v9 = vmul.f32 -1.442695, %v1893_v47 }
 0x446   : > { %2154 = vpow2.f32 %v1842_v22 }
 0x447   : > { %2156 = vpow2.f32 %v1843_v9 }
 0x44e   : > { %v2151_v23 = vpop.eup %2150 }
 0x44f   : > { %v2153_v24 = vpop.eup %2152  ;;  %v1310_v10 = vadd.f32 1.0, %v2151_v23  ;;  %v1277_v57 = vpop.f32.mrb[4].mxu0 }
 0x450   : > { %v2155_v27 = vpop.eup %2154  ;;  %v1311_v54 = vadd.f32 1.0, %v2153_v24  ;;  %v1894_v28 = vadd.f32 %v1277_v57, %v853_v61  ;;  %v1279_v29 = vpop.f32.mrb[5].mxu0 }
 0x451   : > { %v2157_v30 = vpop.eup %2156  ;;  %2158 = vrcp.f32 %v1310_v10  ;;  %v1312_v31 = vadd.f32 1.0, %v2155_v27  ;;  %v1895_v32 = vadd.f32 %v1279_v29, %v857_v62  ;;  %v1281_v33 = vpop.f32.mrb[6].mxu0 }
 0x452   : > { %2160 = vrcp.f32 %v1311_v54  ;;  %v1313_v34 = vadd.f32 1.0, %v2157_v30  ;;  %v1844_v35 = vmul.f32 -1.442695, %v1894_v28  ;;  %v1896_v36 = vadd.f32 %v1281_v33, %v853_v61  ;;  %v1283_v37 = vpop.f32.mrb[7].mxu0 }
 0x453   : > { %2162 = vrcp.f32 %v1312_v31  ;;  %v1845_v38 = vmul.f32 -1.442695, %v1895_v32  ;;  %v1897_v39 = vadd.f32 %v1283_v37, %v857_v62 }
 0x454   : > { %2164 = vrcp.f32 %v1313_v34  ;;  %v1846_v40 = vmul.f32 -1.442695, %v1896_v36 }
 0x455   : > { %2166 = vpow2.f32 %v1844_v35  ;;  %v1847_v41 = vmul.f32 -1.442695, %v1897_v39 }
 0x456   : > { %2168 = vpow2.f32 %v1845_v38 }
 0x457   : > { %2170 = vpow2.f32 %v1846_v40 }
 0x458   : > { %2172 = vpow2.f32 %v1847_v41 }
 0x45b   : > { %v2159_v43 = vpop.eup %2158 }
 0x45c   : > { %v2161_v44 = vpop.eup %2160  ;;  %v1342_v45 = vsub.f32 1.0, %v2159_v43  ;;  %v1334_v16 = vmul.f32 %v2159_v43, %v308_v56 }
 0x45d   : > { %v2163_v46 = vpop.eup %2162  ;;  %v1343_v48 = vsub.f32 1.0, %v2161_v44  ;;  %v1335_v47 = vmul.f32 %v2161_v44, %v309_v50 }
 0x45e   : > { %v2165_v51 = vpop.eup %2164  ;;  %v1344_v59 = vsub.f32 1.0, %v2163_v46  ;;  %v1350_v61 = vmul.f32 %v1342_v45, %v2710_v12  ;;  %v1336_v42 = vmul.f32 %v2163_v46, %v310_v49 }
 0x45f   : > { %v2167_v2 = vpop.eup %2166  ;;  %v1345_v13 = vsub.f32 1.0, %v2165_v51  ;;  %v1351_v62 = vmul.f32 %v1343_v48, %v2702_v3  ;;  %v1337_v12 = vmul.f32 %v2165_v51, %v311_v55 }
 0x460   : > { %v2169_v14 = vpop.eup %2168  ;;  %v1314_v15 = vadd.f32 1.0, %v2167_v2  ;;  %v1352_v17 = vmul.f32 %v1344_v59, %v2698_v63  ;;  %v1358_v23 = vadd.f32 %v1350_v61, %v1334_v16 }
 0x461   : > { %v2171_v19 = vpop.eup %2170  ;;  %v1315_v20 = vadd.f32 1.0, %v2169_v14  ;;  %v1353_v3 = vmul.f32 %v1345_v13, %v2706_v4  ;;  %v1359_v49 = vadd.f32 %v1351_v62, %v1335_v47 }
 0x462   : > { %v2173_v22 = vpop.eup %2172  ;;  %2174 = vrcp.f32 %v1314_v15  ;;  %v1316_v9 = vadd.f32 1.0, %v2171_v19  ;;  %v1360_v56 = vadd.f32 %v1352_v17, %v1336_v42 }
 0x463   : > { %2176 = vrcp.f32 %v1315_v20  ;;  %v1317_v24 = vadd.f32 1.0, %v2173_v22  ;;  %v1361_v10 = vadd.f32 %v1353_v3, %v1337_v12 }
 0x464   : > { %2178 = vrcp.f32 %v1316_v9  ;;  %v1366_v63 = vpack.c.bf16 %v1360_v56, %v1358_v23 }
 0x465   : > { %2180 = vrcp.f32 %v1317_v24  ;;  %v1367_v57 = vpack.c.bf16 %v1361_v10, %v1359_v49 }
 0x467   : > { %1606 = vmatprep.mubr.bf16.mxu1 %v1367_v57 }
 0x468   : > { %1607 = vmatmul.mubr.bf16.vlgmr.msra.gmra.mrb[32].mxu1 %v1366_v63 }
 0x46c   : > { %v2175_v0 = vpop.eup %2174 }
 0x46d   : > { %v2177_v1 = vpop.eup %2176  ;;  %v1346_v50 = vsub.f32 1.0, %v2175_v0  ;;  %v1338_v31 = vmul.f32 %v2175_v0, %v312_v21 }
 0x46e   : > { %v2179_v55 = vpop.eup %2178  ;;  %v1347_v4 = vsub.f32 1.0, %v2177_v1  ;;  %v1339_v34 = vmul.f32 %v2177_v1, %v313_v6 }
 0x46f   : > { %v2181_v27 = vpop.eup %2180  ;;  %v1348_v54 = vsub.f32 1.0, %v2179_v55  ;;  %v1354_v28 = vmul.f32 %v1346_v50, %v2734_v11  ;;  %v1340_v32 = vmul.f32 %v2179_v55, %v314_v18  ;;  %v1402_v18 = vld [vmem:[%s2838_s5] sm:$0x3] }
 0x470   : > { %v1349_v29 = vsub.f32 1.0, %v2181_v27  ;;  %v1355_v30 = vmul.f32 %v1347_v4, %v2726_v52  ;;  %v1341_v35 = vmul.f32 %v2181_v27, %v315_v7  ;;  %v1407_v5 = vrot.slane %v1402_v18, %v852_v58 }
 0x471   : > { %v1356_v33 = vmul.f32 %v1348_v54, %v2722_v25  ;;  %v1362_v36 = vadd.f32 %v1354_v28, %v1338_v31  ;;  %v1411_v8 = vrot.slane %v1402_v18, %v856_v60 }
 0x472   : > { %v1357_v11 = vmul.f32 %v1349_v29, %v2730_v26  ;;  %v1363_v52 = vadd.f32 %v1355_v30, %v1339_v34 }
 0x473   : > { %v1364_v37 = vadd.f32 %v1356_v33, %v1340_v32 }
 0x474   : > { %v1365_v38 = vadd.f32 %v1357_v11, %v1341_v35 }
 0x475   : > { %v1368_v39 = vpack.c.bf16 %v1364_v37, %v1362_v36 }
 0x476   : > { %v1369_v40 = vpack.c.bf16 %v1365_v38, %v1363_v52 }
 0x478   : > { %1616 = vmatprep.mubr.bf16.mxu1 %v1369_v40 }
 0x479   : > { %1617 = vmatmul.mubr.bf16.gmra.mrb[36].mxu1 %v1368_v39 }
 0x53b   : > { %v1608_v6 = vpop.f32.mrb[32].mxu1 }
 0x53c   : > { %v1609_v7 = vadd.f32 %v1608_v6, %v1407_v5  ;;  %v1610_v21 = vpop.f32.mrb[33].mxu1 }
 0x53d   : > { %v1611_v25 = vadd.f32 %v1610_v21, %v1411_v8  ;;  %v1612_v26 = vpop.f32.mrb[34].mxu1 }
 0x53e   : > { %1627 = vst [vmem:[%s300_s17] sm:$0xff] %v1609_v7  ;;  %v1613_v41 = vadd.f32 %v1612_v26, %v1407_v5  ;;  %v1614_v43 = vpop.f32.mrb[35].mxu1 }
 0x53f   : > { %1628 = vst [vmem:[%s300_s17 + $0x8] sm:$0xff] %v1611_v25  ;;  %v1615_v44 = vadd.f32 %v1614_v43, %v1411_v8 }
 0x540   : > { %1629 = vst [vmem:[%s300_s17 + $0x10] sm:$0xff] %v1613_v41 }
 0x541   : > { %1630 = vst [vmem:[%s300_s17 + $0x18] sm:$0xff] %v1615_v44 }
 0x54c   : > { %v1618_v58 = vpop.f32.mrb[36].mxu1 }
 0x54d   : > { %v1619_v53 = vadd.f32 %v1618_v58, %v1407_v5  ;;  %v1620_v60 = vpop.f32.mrb[37].mxu1 }
 0x54e   : > { %v1621_v45 = vadd.f32 %v1620_v60, %v1411_v8  ;;  %v1622_v46 = vpop.f32.mrb[38].mxu1 }
 0x54f   : > { %1631 = vst [vmem:[%s300_s17 + $0x20] sm:$0xff] %v1619_v53  ;;  %v1623_v48 = vadd.f32 %v1622_v46, %v1407_v5  ;;  %v1624_v51 = vpop.f32.mrb[39].mxu1 }
 0x550   : > { %1632 = vst [vmem:[%s300_s17 + $0x28] sm:$0xff] %v1621_v45  ;;  %v1625_v59 = vadd.f32 %v1624_v51, %v1411_v8 }
 0x551   : > { %1633 = vst [vmem:[%s300_s17 + $0x30] sm:$0xff] %v1623_v48 }
 0x552   : > { %1634 = vst [vmem:[%s300_s17 + $0x38] sm:$0xff] %v1625_v59 }
 0x553   : > { %2281 = shalt.err (!%p2278_p1)
}
 0x554   : > { %s2282_s30 = scalar_lea.hbm %s2789_s12, 1024  ;;  %s2286_s15 = scalar_lea.hbm %s2839_s6, 2048 }
 0x555   : > { %p2283_p13 = scmp.ne.s32.totalorder %s2789_s12, %s2282_s30  ;;  %p2287_p4 = scmp.lt.u32.totalorder %s2789_s12, %s2839_s6 }
 0x556   : > { %p2288_p5 = scmp.lt.u32.totalorder %s2286_s15, %s2282_s30  ;;  %p2290_p8 = scmp.lt.u32.totalorder %s2282_s30, %s2789_s12 }
 0x557   : > { %p2284_p6 = pnand %p2283_p13, %p2853_p0 }
 0x558   : > { %p2289_p11 = por %p2288_p5, %p2287_p4 }
 0x559   : > { %p2285_p10 = pneg %p2284_p6 }
 0x55a   : > { %p2291_p2 = por %p2290_p8, %p2289_p11 }
 0x55c   : > { %p2292_p3 = pnand %p2291_p2, %p2285_p10 }
 0x55e   : > { %2295 = shalt.err (!%p2292_p3)
}
 0x55f   : > { %s2347_s10 = smov 256   ;;  %s2348_s16 = smov 16  }
 0x560   : > { %1916 = dma.vmem_to_hbm [thread:$0]  (%p2853_p0), %s2784_s18, 1024, %s2789_s12, %s1636_s0, %s2347_s10, %s2347_s10, %s2348_s16  }
 0x561 PF: > { %s1665_s22 = sand.u32 1, %s2326_s23   ;;  %p2854_p7 = scmp.ne.s32.totalorder %s2844_s29, 0 }
 0x562   : > { %p2855_p9 = scmp.ge.s32.totalorder %s2338_s26, 2  ;;  %s1666_s11 = scalar_lea.sflag [#allocation5], %s1665_s22 }
 0x564   : > { %p1930_p12 = pnand %p2855_p9, %p2854_p7 }
 0x566   : > { %2321 = dma.done.wait (!%p1930_p12), %s1666_s11, 1024  }
 0x567   : > { %2323 = vsyncadd (!%p1930_p12), %s1666_s11, 4294966272  ;;  %p21_p1 = scmp.ge.s32.totalorder %s2503_s9, 4   ;;  %s2856_s23 = smov %s2330_s24 }
 0x568   : > { %s2857_s24 = smov %s2334_s25  ;;  %s2858_s25 = smov %s2519_s7 }
 0x569   : > { %s2859_s26 = smov %s2503_s9  ;;  %23 = sbr.rel (!%p21_p1) target bundleno = 8 (0x8), region = 97 }
 0x570   :  { %1671 = vsyncpa [#allocation4], 1 }
 0x571   :  { %1673 = vsyncpa [#allocation4 + $0x1], 1 }
 0x572   :  { %1674 = vsyncpa [#allocation7], 1 }
 0x573   :  { %1675 = vsyncpa [#allocation5], 1 }
 0x574   :  { %1677 = vsyncpa [#allocation5 + $0x1], 1 }

// kernel: tpu_custom_call.1
= control target key start
LH: loop header
LB: loop body
LE: loop exit
PB: predicated region body
PF: predicated region fallthrough
CT: control target
= control target key end

     0   :  { %s2833_s0 = inlined_call_operand.<no memory space> [shape: f32[1], index: 0, kind: input, shape index: {}]   ;;  %s2834_s1 = inlined_call_operand.hbm [shape: bf16[8,8,256], index: 1, kind: input, shape index: {}]   ;;  %s2835_s2 = inlined_call_operand.hbm [shape: bf16[512,256], index: 2, kind: input, shape index: {}]   ;;  %s2836_s3 = inlined_call_operand.vmem [shape: f32[1,256], index: 3, kind: input, shape index: {}]   ;;  %s2837_s4 = inlined_call_operand.hbm [shape: bf16[256,256], index: 4, kind: input, shape index: {}]   ;;  %s2838_s5 = inlined_call_operand.vmem [shape: f32[1,256], index: 5, kind: input, shape index: {}]   ;;  %s2839_s6 = inlined_call_operand.hbm [shape: f32[8,8,256], index: 6, kind: output, shape index: {}]  }
   0x1   :  { %11 = sst [smem:[#allocation2]] %s2833_s0 }
   0x2   :  { %12 = vsyncpa [#allocation4], 0 }
   0x3   :  { %14 = vsyncpa [#allocation4 + $0x1], 0 }
   0x4   :  { %15 = vsyncpa [#allocation7], 0 }
   0x5   :  { %16 = vsyncpa [#allocation5], 0 }
   0x6   :  { %18 = vsyncpa [#allocation5 + $0x1], 0  ;;  %s2387_s23 = smov 0   ;;  %s2389_s24 = smov 0  }
   0x7   :  { %s2391_s25 = smov 0   ;;  %s2393_s26 = smov 0  }
   0x8 LB: > { %s2408_s0 = sadd.s32 4294967295, %s2338_s26   ;;  %s1742_s27 = sadd.s32 4294967294, %s2338_s26   ;;  %s2338_s26 = sphi %s2393_s26, %s2859_s26   ;;  %s2334_s25 = sphi %s2391_s25, %s2858_s25   ;;  %s2330_s24 = sphi %s2389_s24, %s2857_s24   ;;  %s2326_s23 = sphi %s2387_s23, %s2856_s23  }
   0x9   : > { %p65_p0 = scmp.ne.s32.totalorder %s2330_s24, %s2326_s23  ;;  %p2840_p1 = scmp.eq.s32.totalorder %s2408_s0, 0 }
   0xa   : > { %p179_p3 = scmp.eq.s32.totalorder %s1742_s27, 1  ;;  %p1743_p5 = scmp.ge.s32.totalorder %s2338_s26, 1 }
   0xb   : > { %p2417_p4 = por %p2840_p1, %p65_p0  ;;  %p186_p7 = scmp.lt.s32.totalorder %s2338_s26, 3 }
   0xc   : > { %p2422_p6 = por %p179_p3, %p65_p0  ;;  %s2340_s7 = smov [#allocation6]  }
   0xd   : > { %s2843_s28 = scalar_select %p2417_p4, 1, 0 }
   0xe   : > { %s2844_s29 = scalar_select %p2422_p6, 1, 0 }
   0xf   : > { %p2427_p8 = pnand %p1743_p5, %p186_p7  ;;  %s201_s8 = sshll.u32 %s2340_s7, 4  ;;  %s2431_s8 = int_to_ptr.vmem [resolvable:$true] %s201_s8 }
  0x10   : > { %s2341_s10 = smov [#allocation8]   ;;  %s2182_s14 = scalar_lea.hbm %s2835_s2, 8192 }
  0x11   : > { %p1918_p9 = pneg %p2427_p8  ;;  %s217_s11 = sshll.u32 %s2341_s10, 4  ;;  %s2442_s11 = int_to_ptr.vmem [resolvable:$true] %s217_s11 }
  0x12   : > { %p2183_p12 = scmp.ne.s32.totalorder %s2835_s2, %s2182_s14  ;;  %p2189_p5 = scmp.lt.u32.totalorder %s2182_s14, %s2835_s2 }
  0x13   : > { %p2438_p11 = pnand %p1918_p9, %p2840_p1 }
  0x15   : > { %p2184_p13 = pneg %p2438_p11 }
  0x17   : > { %p2185_p0 = pnand %p2184_p13, %p2183_p12 }
  0x19   : > { %p2186_p3 = pneg %p2185_p0 }
  0x1b   : > { %p2191_p7 = pnand %p2189_p5, %p2186_p3 }
  0x1d   : > { %2194 = shalt.err (!%p2191_p7)
}
  0x1e   : > { %s2195_s19 = scalar_lea.vmem %s2431_s8, 8192  ;;  %p2203_p2 = scmp.lt.s32.totalorder %s2431_s8, %s2431_s8 }
  0x1f   : > { %p2196_p9 = scmp.ne.s32.totalorder %s2431_s8, %s2195_s19  ;;  %p2204_p12 = scmp.lt.s32.totalorder %s2195_s19, %s2195_s19 }
  0x21   : > { %p2198_p10 = pnand %p2196_p9, %p2184_p13  ;;  %p2205_p0 = por %p2204_p12, %p2203_p2 }
  0x23   : > { %p2199_p1 = pneg %p2198_p10 }
  0x25   : > { %p2206_p6 = pnand %p2205_p0, %p2199_p1 }
  0x27   : > { %2209 = shalt.err (!%p2206_p6)
}
  0x28   : > { %s2342_s20 = smov 128   ;;  %s2343_s21 = smov 8  }
  0x29   : > { %1921 = dma.hbm_to_vmem [thread:$0]  (!%p2438_p11), %s2835_s2, 8192, %s2431_s8, [#allocation7], %s2342_s20, %s2342_s20, %s2343_s21  }
  0x2a   : > { %s2210_s12 = scalar_lea.hbm %s2837_s4, 4096 }
  0x2b   : > { %p2211_p1 = scmp.ne.s32.totalorder %s2837_s4, %s2210_s12  ;;  %p2217_p10 = scmp.lt.u32.totalorder %s2210_s12, %s2837_s4 }
  0x2d   : > { %p2213_p2 = pnand %p2211_p1, %p2184_p13 }
  0x2f   : > { %p2214_p6 = pneg %p2213_p2 }
  0x31   : > { %p2219_p3 = pnand %p2217_p10, %p2214_p6 }
  0x33   : > { %2222 = shalt.err (!%p2219_p3)
}
  0x34   : > { %s2223_s8 = scalar_lea.vmem %s2442_s11, 4096  ;;  %p2231_p12 = scmp.lt.s32.totalorder %s2442_s11, %s2442_s11 }
  0x35   : > { %p2224_p5 = scmp.ne.s32.totalorder %s2442_s11, %s2223_s8  ;;  %p2232_p0 = scmp.lt.s32.totalorder %s2223_s8, %s2223_s8 }
  0x37   : > { %p2226_p7 = pnand %p2224_p5, %p2184_p13  ;;  %p2233_p1 = por %p2232_p0, %p2231_p12 }
  0x39   : > { %p2227_p9 = pneg %p2226_p7 }
  0x3b   : > { %p2234_p2 = pnand %p2233_p1, %p2227_p9 }
  0x3d   : > { %2237 = shalt.err (!%p2234_p2)
}
  0x3e   : > { %1924 = dma.hbm_to_vmem [thread:$0]  (!%p2438_p11), %s2837_s4, 4096, %s2442_s11, [#allocation7], %s2342_s20, %s2342_s20, %s2343_s21  }
  0x3f   : > { %s2503_s9 = sadd.s32 1, %s2338_s26   ;;  %s52_s19 = sadd.s32 1, %s2334_s25 }
  0x40   : > { %s49_s22 = ssub.s32 %s2338_s26, %s2503_s9  ;;  %p59_p13 = scmp.ne.s32.totalorder %s2334_s25, %s2330_s24 }
  0x41   : > { %p50_p6 = scmp.eq.s32.totalorder %s49_s22, 0  ;;  %p60_p10 = scmp.eq.s32.totalorder %s2338_s26, 0 }
  0x42   : > { %p2847_p3 = scmp.eq.s32.totalorder %s2408_s0, 1  ;;  %p1935_p7 = scmp.lt.s32.totalorder %s2338_s26, 2 }
  0x43   : > { %s2519_s7 = scalar_select %p50_p6, %s2334_s25, %s52_s19  }
  0x44   : > { %p2513_p5 = por %p2847_p3, %p59_p13  ;;  %p61_p9 = por %p60_p10, %p59_p13 }
  0x45   : > { %s234_s10 = sand.u32 1, %s2334_s25   ;;  %s1887_s11 = sshll.u32 %s2338_s26, 9 }
  0x46   : > { %s2848_s27 = scalar_select %p2513_p5, 1, 0 }
  0x47   : > { %s1747_s12 = sshll.u32 %s234_s10, 5  ;;  %s2526_s15 = scalar_lea.hbm %s2834_s1, %s1887_s11 }
  0x48   : > { %s238_s16 = scalar_lea.vmem [#allocation3], %s1747_s12  ;;  %p2530_p11 = pnand %p1935_p7, %p61_p9 }
  0x49   : > { %s246_s8 = sshll.u32 %s238_s16, 4  ;;  %s2534_s18 = scalar_lea.sflag [#allocation4], %s234_s10  ;;  %s2528_s8 = int_to_ptr.vmem [resolvable:$true] %s246_s8 }
  0x4a   : > { %s2238_s19 = scalar_lea.hbm %s2526_s15, 512  ;;  %p2240_p0 = pneg %p2530_p11 }
  0x4b   : > { %p2239_p12 = scmp.ne.s32.totalorder %s2526_s15, %s2238_s19  ;;  %s2243_s11 = scalar_lea.hbm %s2834_s1, 1024 }
  0x4c   : > { %p2244_p13 = scmp.lt.u32.totalorder %s2526_s15, %s2834_s1  ;;  %p2245_p6 = scmp.lt.u32.totalorder %s2243_s11, %s2238_s19 }
  0x4d   : > { %p2241_p1 = pnand %p2240_p0, %p2239_p12  ;;  %p2247_p3 = scmp.lt.u32.totalorder %s2238_s19, %s2526_s15 }
  0x4e   : > { %p2246_p10 = por %p2245_p6, %p2244_p13 }
  0x4f   : > { %p2242_p2 = pneg %p2241_p1 }
  0x50   : > { %p2248_p7 = por %p2247_p3, %p2246_p10 }
  0x52   : > { %p2249_p9 = pnand %p2248_p7, %p2242_p2 }
  0x54   : > { %2252 = shalt.err (!%p2249_p9)
}
  0x55   : > { %s2253_s10 = scalar_lea.vmem %s2528_s8, 512  ;;  %s2344_s16 = smov [#allocation3]  }
  0x56   : > { %p2254_p12 = scmp.ne.s32.totalorder %s2528_s8, %s2253_s10  ;;  %s2258_s22 = sshll.u32 %s2344_s16, 4  ;;  %s2259_s22 = int_to_ptr.vmem [resolvable:$false] %s2258_s22 }
  0x57   : > { %s2260_s12 = scalar_lea.vmem %s2259_s22, 1024  ;;  %p2261_p4 = scmp.lt.s32.totalorder %s2528_s8, %s2259_s22 }
  0x58   : > { %p2256_p1 = pnand %p2254_p12, %p2240_p0  ;;  %p2262_p13 = scmp.lt.s32.totalorder %s2260_s12, %s2253_s10 }
  0x5a   : > { %p2257_p5 = pneg %p2256_p1  ;;  %p2263_p6 = por %p2262_p13, %p2261_p4 }
  0x5c   : > { %p2264_p10 = pnand %p2263_p6, %p2257_p5 }
  0x5e   : > { %2267 = shalt.err (!%p2264_p10)
}
  0x5f   : > { %1928 = dma.hbm_to_vmem [thread:$0]  (!%p2530_p11), %s2526_s15, 512, %s2528_s8, %s2534_s18, %s2342_s20, %s2342_s20, %s2343_s21  }
  0x60   : > { %258 = sbr.rel (%p2427_p8) target bundleno = 1377 (0x561), region = 44  ;;  %s2568_s19 = sand.u32 (!%p2427_p8), 1, %s2330_s24  }
  0x61   : > { %s1752_s11 = sshll.u32 (!%p2427_p8), %s2568_s19, 5  ;;  %s261_s13 = scalar_lea.sflag (!%p2427_p8), [#allocation4], %s2568_s19 }
  0x62   : > { %s264_s14 = scalar_lea.vmem (!%p2427_p8), [#allocation3], %s1752_s11  ;;  %p2850_p4 = scmp.ne.s32.totalorder (!%p2427_p8), %s2843_s28, 0 }
  0x67   : > { %2313 = dma.done.wait (%p2850_p4), %s261_s13, 512  }
  0x68   : > { %2315 = vsyncadd (%p2850_p4), %s261_s13, 4294966784  ;;  %p2851_p5 = scmp.eq.s32.totalorder %s2408_s0, 0 }
  0x6a   : > { %2317 = dma.done.wait (%p2851_p5), [#allocation7], 12288   ;;  %p2852_p11 = pmov %p2851_p5 }
  0x6b   : > { %v2580_v0 = vld [vmem:[%s264_s14] sm:$0xff]  ;;  %v2582_v1 = vld [vmem:[%s264_s14 + $0x8] sm:$0xff]  ;;  %v2599_v5 = vld [vmem:[%s264_s14 + $0x10] sm:$0xff]  ;;  %vm508_vm0 = vcmask 64512   ;;  %vm560_vm1 = vcmask 1043456   ;;  %v2345_v57 = vmov 0  }
  0x6c   : > { %2319 = vsyncadd (%p2852_p11), [#allocation7], 4294955008  ;;  %v2586_v2 = vcombine.high %v2580_v0, %v2580_v0  ;;  %v2590_v3 = vcombine.low %v2580_v0, %v2580_v0  ;;  %v2594_v4 = vcombine.high %v2582_v1, %v2582_v1  ;;  %v2604_v6 = vcombine.low %v2582_v1, %v2582_v1  ;;  %v2613_v8 = vld [vmem:[%s264_s14 + $0x18] sm:$0xff]  ;;  %v1986_v58 = vld [vmem:[#allocation6 + $0x4] ss:$8 sps:$4 sm:$0xff]   ;;  %s758_s28 = sld [smem:[#allocation2]] }
  0x6d   : > { %v2608_v7 = vcombine.high %v2599_v5, %v2599_v5  ;;  %v2618_v9 = vcombine.low %v2599_v5, %v2599_v5  ;;  %v2622_v10 = vcombine.high %v2613_v8, %v2613_v8  ;;  %v2630_v11 = vcombine.low %v2613_v8, %v2613_v8  ;;  %v1988_v59 = vld [vmem:[#allocation6] ss:$8 sps:$4 sm:$0xff]   ;;  %v1989_v60 = vld [vmem:[#allocation6 + $0x14] ss:$8 sps:$4 sm:$0xff]   ;;  %1180 = vmatprep.subr.bf16.mxu0 %v1986_v58  ;;  %v1991_v62 = vld [vmem:[#allocation6 + $0x10] ss:$8 sps:$4 sm:$0xff]  }
  0x6e   : > { %323 = vmatprep.subr.bf16.mxu1 %v2586_v2  ;;  %355 = vmatprep.mubr.bf16.mxu1 %v2586_v2  ;;  %v562_v56 = vsel %vm560_vm1, %v2590_v3, 0  ;;  %v1773_v61 = vcombine.high %v2580_v0, %v2582_v1  ;;  %v1992_v63 = vld [vmem:[#allocation6 + $0x24] ss:$8 sps:$4 sm:$0xff]   ;;  %v2057_v58 = vld [vmem:[#allocation6 + $0x170] ss:$8 sps:$4 sm:$0xff]   ;;  %s1755_s8 = sshll.u32 %s2568_s19, 6 }
  0x6f   : > { %324 = vmatpush1.bf16.xpose.msra.mxu1 %v2590_v3  ;;  %1181 = vmatpush1.bf16.msra.mxu0 %v1988_v59  ;;  %v2062_v59 = vld [vmem:[#allocation6 + $0x184] ss:$8 sps:$4 sm:$0xff]   ;;  %s300_s17 = scalar_lea.vmem [#allocation9], %s1755_s8  ;;  %s1889_s10 = sshll.u32 %s2408_s0, 10 }
  0x70   : > { %370 = vmatprep.subr.bf16.mxu1 %v2594_v4  ;;  %1212 = vmatprep.mubr.bf16.mxu0 %v1773_v61  ;;  %s1650_s18 = sshll.u32 %s300_s17, 4  ;;  %s2789_s12 = scalar_lea.hbm %s2839_s6, %s1889_s10  ;;  %s2784_s18 = int_to_ptr.vmem [resolvable:$true] %s1650_s18 }
  0x71   : > { %1182 = vmatprep.subr.bf16.mxu0 %v1989_v60  ;;  %v2060_v60 = vld [vmem:[#allocation6 + $0x180] ss:$8 sps:$4 sm:$0xff]   ;;  %s1636_s0 = scalar_lea.sflag [#allocation5], %s2568_s19  ;;  %s2268_s11 = scalar_lea.vmem %s2784_s18, 1024 }
  0x72   : > { %p2269_p8 = scmp.ne.s32.totalorder %s2784_s18, %s2268_s11  ;;  %p2853_p0 = scmp.ne.s32.totalorder %s2848_s27, 0 }
  0x73   : > { %1183 = vmatpush1.bf16.msra.mxu0 %v1991_v62  ;;  %v2065_v62 = vld [vmem:[#allocation6 + $0x194] ss:$8 sps:$4 sm:$0xff]   ;;  %s2346_s13 = smov [#allocation9]  }
  0x74   : > { %1184 = vmatprep.subr.bf16.mxu0 %v1992_v63  ;;  %p2270_p2 = pnand %p2269_p8, %p2853_p0  ;;  %s2272_s14 = sshll.u32 %s2346_s13, 4  ;;  %s2273_s14 = int_to_ptr.vmem [resolvable:$false] %s2272_s14 }
  0x75   : > { %p2275_p7 = scmp.lt.s32.totalorder %s2784_s18, %s2273_s14 }
  0x76   : > { %356 = vmatmul.mubr.bf16.vlgmr.msra.gmra.mrb[0].mxu1 %v2590_v3  ;;  %v1995_v3 = vld [vmem:[#allocation6 + $0x34] ss:$8 sps:$4 sm:$0xff]   ;;  %p2271_p3 = pneg %p2270_p2 }
  0x77   : > { %371 = vmatpush1.bf16.xpose.msra.mxu1 %v2604_v6  ;;  %402 = vmatprep.mubr.bf16.mxu1 %v2594_v4 }
  0x78   : > { %417 = vmatprep.subr.bf16.mxu1 %v2608_v7 }
  0x7e   : > { %403 = vmatmul.mubr.bf16.vlgmr.msra.gmra.mrb[4].mxu1 %v2604_v6 }
  0x7f   : > { %418 = vmatpush1.bf16.xpose.msra.mxu1 %v2618_v9  ;;  %449 = vmatprep.mubr.bf16.mxu1 %v2608_v7 }
  0x80   : > { %464 = vmatprep.subr.bf16.mxu1 %v2622_v10 }
  0x86   : > { %450 = vmatmul.mubr.bf16.vlgmr.msra.gmra.mrb[8].mxu1 %v2618_v9 }
  0x87   : > { %465 = vmatpush1.bf16.xpose.msra.mxu1 %v2630_v11  ;;  %496 = vmatprep.mubr.bf16.mxu1 %v2622_v10 }
  0x88   : > { %1764 = vmatprep.subr.msk.bf16.mxu1 %vm560_vm1, %v2586_v2  ;;  %v1994_v2 = vld [vmem:[#allocation6 + $0x20] ss:$8 sps:$4 sm:$0xff]  }
  0x89   : > { %1185 = vmatpush1.bf16.msra.mxu0 %v1994_v2  ;;  %v2063_v2 = vld [vmem:[#allocation6 + $0x190] ss:$8 sps:$4 sm:$0xff]  }
  0x8a   : > { %1186 = vmatprep.subr.bf16.mxu0 %v1995_v3 }
  0x8e   : > { %497 = vmatmul.mubr.bf16.vlgmr.msra.gmra.mrb[12].mxu1 %v2630_v11 }
  0x8f   : > { %568 = vmatpush1.bf16.msra.mxu1 %v562_v56  ;;  %599 = vmatprep.mubr.bf16.mxu1 %v2345_v57  ;;  %v2059_v56 = vld [vmem:[#allocation6 + $0x174] ss:$8 sps:$4 sm:$0xff]  }
  0x90   : > { %1766 = vmatprep.subr.msk.bf16.mxu1 %vm560_vm1, %v2594_v4  ;;  %v1997_v4 = vld [vmem:[#allocation6 + $0x30] ss:$8 sps:$4 sm:$0xff]  }
  0x91   : > { %1187 = vmatpush1.bf16.msra.mxu0 %v1997_v4  ;;  %v2068_v4 = vld [vmem:[#allocation6 + $0x1a4] ss:$8 sps:$4 sm:$0xff]  }
 0x149   : > { %v357_v12 = vpop.f32.mrb[0].mxu1 }
 0x14a   : > { %v504_v13 = vmul.f32 0.0625, %v357_v12  ;;  %v359_v14 = vpop.f32.mrb[1].mxu1  ;;  %v1998_v12 = vld [vmem:[#allocation6 + $0x44] ss:$8 sps:$4 sm:$0xff]  }
 0x14b   : > { %v360_v15 = vpop.f32.mrb[2].mxu1  ;;  %1188 = vmatprep.subr.bf16.mxu0 %v1998_v12  ;;  %v2001_v14 = vld [vmem:[#allocation6 + $0x54] ss:$8 sps:$4 sm:$0xff]  }
 0x14c   : > { %v361_v16 = vpop.f32.mrb[3].mxu1  ;;  %v509_v17 = vsel %vm508_vm0, %v504_v13, -inf  ;;  %v2003_v15 = vld [vmem:[#allocation6 + $0x50] ss:$8 sps:$4 sm:$0xff]  }
 0x14d   : > { %510 = vmax.xlane.f32.xlu0 %v509_v17  ;;  %v2004_v16 = vld [vmem:[#allocation6 + $0x64] ss:$8 sps:$4 sm:$0xff]   ;;  %v2006_v17 = vld [vmem:[#allocation6 + $0x60] ss:$8 sps:$4 sm:$0xff]  }
 0x151   : > { %v404_v18 = vpop.f32.mrb[4].mxu1 }
 0x152   : > { %v505_v19 = vmul.f32 0.0625, %v404_v18  ;;  %v406_v20 = vpop.f32.mrb[5].mxu1  ;;  %v2007_v18 = vld [vmem:[#allocation6 + $0x74] ss:$8 sps:$4 sm:$0xff]  }
 0x153   : > { %v407_v21 = vpop.f32.mrb[6].mxu1  ;;  %v2010_v20 = vld [vmem:[#allocation6 + $0x84] ss:$8 sps:$4 sm:$0xff]  }
 0x154   : > { %v408_v22 = vpop.f32.mrb[7].mxu1  ;;  %v512_v23 = vsel %vm508_vm0, %v505_v19, -inf  ;;  %v2012_v21 = vld [vmem:[#allocation6 + $0x80] ss:$8 sps:$4 sm:$0xff]  }
 0x155   : > { %513 = vmax.xlane.f32.xlu0 %v512_v23  ;;  %v2013_v22 = vld [vmem:[#allocation6 + $0x94] ss:$8 sps:$4 sm:$0xff]   ;;  %v2015_v23 = vld [vmem:[#allocation6 + $0x90] ss:$8 sps:$4 sm:$0xff]  }
 0x159   : > { %v451_v24 = vpop.f32.mrb[8].mxu1 }
 0x15a   : > { %v506_v25 = vmul.f32 0.0625, %v451_v24  ;;  %v453_v26 = vpop.f32.mrb[9].mxu1  ;;  %v2016_v24 = vld [vmem:[#allocation6 + $0xa4] ss:$8 sps:$4 sm:$0xff]  }
 0x15b   : > { %v454_v27 = vpop.f32.mrb[10].mxu1  ;;  %v2019_v26 = vld [vmem:[#allocation6 + $0xb4] ss:$8 sps:$4 sm:$0xff]  }
 0x15c   : > { %v455_v28 = vpop.f32.mrb[11].mxu1  ;;  %v515_v29 = vsel %vm508_vm0, %v506_v25, -inf  ;;  %v2021_v27 = vld [vmem:[#allocation6 + $0xb0] ss:$8 sps:$4 sm:$0xff]  }
 0x15d   : > { %516 = vmax.xlane.f32.xlu1 %v515_v29  ;;  %v2022_v28 = vld [vmem:[#allocation6 + $0xc4] ss:$8 sps:$4 sm:$0xff]   ;;  %v2024_v29 = vld [vmem:[#allocation6 + $0xc0] ss:$8 sps:$4 sm:$0xff]  }
 0x161   : > { %v498_v30 = vpop.f32.mrb[12].mxu1 }
 0x162   : > { %v507_v31 = vmul.f32 0.0625, %v498_v30  ;;  %v500_v32 = vpop.f32.mrb[13].mxu1  ;;  %v2025_v30 = vld [vmem:[#allocation6 + $0xd4] ss:$8 sps:$4 sm:$0xff]  }
 0x163   : > { %v501_v33 = vpop.f32.mrb[14].mxu1  ;;  %v2028_v32 = vld [vmem:[#allocation6 + $0xe4] ss:$8 sps:$4 sm:$0xff]  }
 0x164   : > { %v502_v34 = vpop.f32.mrb[15].mxu1  ;;  %v518_v35 = vsel %vm508_vm0, %v507_v31, -inf  ;;  %v2030_v33 = vld [vmem:[#allocation6 + $0xe0] ss:$8 sps:$4 sm:$0xff]  }
 0x165   : > { %519 = vmax.xlane.f32.xlu1 %v518_v35  ;;  %v2031_v34 = vld [vmem:[#allocation6 + $0xf4] ss:$8 sps:$4 sm:$0xff]   ;;  %v2033_v35 = vld [vmem:[#allocation6 + $0xf0] ss:$8 sps:$4 sm:$0xff]  }
 0x1da   : > { %v511_v36 = vpop.xlane.xlu0 %510 }
 0x1db   : > { %v521_v37 = vsub.f32 %v504_v13, %v511_v36  ;;  %v2000_v13 = vld [vmem:[#allocation6 + $0x40] ss:$8 sps:$4 sm:$0xff]   ;;  %v2037_v36 = vld [vmem:[#allocation6 + $0x104] ss:$8 sps:$4 sm:$0xff]  }
 0x1dc   : > { %1189 = vmatpush1.bf16.msra.mxu0 %v2000_v13  ;;  %v612_v13 = vsel %vm560_vm1, %v2604_v6, 0 }
 0x1dd   : > { %v525_v38 = vmul.f32 1.442695, %v521_v37  ;;  %1190 = vmatprep.subr.bf16.mxu0 %v2001_v14  ;;  %v1772_v37 = vcombine.low %v2580_v0, %v2582_v1  ;;  %v2066_v14 = vld [vmem:[#allocation6 + $0x1a0] ss:$8 sps:$4 sm:$0xff]  }
 0x1df   : > { %2134 = vpow2.f32 %v525_v38  ;;  %v2035_v38 = vld [vmem:[#allocation6 + $0x100] ss:$8 sps:$4 sm:$0xff]  }
 0x1e0   : > { %1191 = vmatpush1.bf16.msra.mxu0 %v2003_v15 }
 0x1e1   : > { %1192 = vmatprep.subr.bf16.mxu0 %v2004_v16  ;;  %v2071_v16 = vld [vmem:[#allocation6 + $0x1b4] ss:$8 sps:$4 sm:$0xff]  }
 0x1e2   : > { %v514_v39 = vpop.xlane.xlu0 %513 }
 0x1e3   : > { %v522_v40 = vsub.f32 %v505_v19, %v514_v39  ;;  %v2009_v19 = vld [vmem:[#allocation6 + $0x70] ss:$8 sps:$4 sm:$0xff]   ;;  %v2041_v39 = vld [vmem:[#allocation6 + $0x114] ss:$8 sps:$4 sm:$0xff]  }
 0x1e4   : > { %1193 = vmatpush1.bf16.msra.mxu0 %v2006_v17  ;;  %v2069_v17 = vld [vmem:[#allocation6 + $0x1b0] ss:$8 sps:$4 sm:$0xff]  }
 0x1e5   : > { %v527_v41 = vmul.f32 1.442695, %v522_v40  ;;  %1194 = vmatprep.subr.bf16.mxu0 %v2007_v18  ;;  %v2039_v40 = vld [vmem:[#allocation6 + $0x110] ss:$8 sps:$4 sm:$0xff]  }
 0x1e7   : > { %2136 = vpow2.f32 %v527_v41  ;;  %v2044_v41 = vld [vmem:[#allocation6 + $0x124] ss:$8 sps:$4 sm:$0xff]  }
 0x1e8   : > { %1195 = vmatpush1.bf16.msra.mxu0 %v2009_v19  ;;  %v662_v19 = vsel %vm560_vm1, %v2618_v9, 0 }
 0x1e9   : > { %v2640_v42 = vpop.eup %2134  ;;  %1196 = vmatprep.subr.bf16.mxu0 %v2010_v20 }
 0x1ea   : > { %v517_v43 = vpop.xlane.xlu1 %516  ;;  %v533_v44 = vsel %vm508_vm0, %v2640_v42, 0.0 }
 0x1eb   : > { %v523_v45 = vsub.f32 %v506_v25, %v517_v43  ;;  %534 = vadd.xlane.f32.xlu0 %v533_v44  ;;  %v2018_v25 = vld [vmem:[#allocation6 + $0xa0] ss:$8 sps:$4 sm:$0xff]   ;;  %v2047_v44 = vld [vmem:[#allocation6 + $0x134] ss:$8 sps:$4 sm:$0xff]  }
 0x1ec   : > { %1197 = vmatpush1.bf16.msra.mxu0 %v2012_v21  ;;  %v2042_v43 = vld [vmem:[#allocation6 + $0x120] ss:$8 sps:$4 sm:$0xff]  }
 0x1ed   : > { %v529_v46 = vmul.f32 1.442695, %v523_v45  ;;  %1198 = vmatprep.subr.bf16.mxu0 %v2013_v22  ;;  %v2045_v45 = vld [vmem:[#allocation6 + $0x130] ss:$8 sps:$4 sm:$0xff]   ;;  %v712_v22 = vsel %vm560_vm1, %v2630_v11, 0  ;;  %v1775_v11 = vcombine.high %v2599_v5, %v2613_v8 }
 0x1ef   : > { %2138 = vpow2.f32 %v529_v46  ;;  %v2050_v46 = vld [vmem:[#allocation6 + $0x144] ss:$8 sps:$4 sm:$0xff]  }
 0x1f0   : > { %1199 = vmatpush1.bf16.msra.mxu0 %v2015_v23 }
 0x1f1   : > { %v2644_v47 = vpop.eup %2136  ;;  %1200 = vmatprep.subr.bf16.mxu0 %v2016_v24 }
 0x1f2   : > { %v520_v48 = vpop.xlane.xlu1 %519  ;;  %v536_v49 = vsel %vm508_vm0, %v2644_v47, 0.0 }
 0x1f3   : > { %v524_v50 = vsub.f32 %v507_v31, %v520_v48  ;;  %537 = vadd.xlane.f32.xlu1 %v536_v49  ;;  %v2027_v31 = vld [vmem:[#allocation6 + $0xd0] ss:$8 sps:$4 sm:$0xff]   ;;  %v2048_v48 = vld [vmem:[#allocation6 + $0x140] ss:$8 sps:$4 sm:$0xff]   ;;  %v2053_v49 = vld [vmem:[#allocation6 + $0x154] ss:$8 sps:$4 sm:$0xff]  }
 0x1f4   : > { %1201 = vmatpush1.bf16.msra.mxu0 %v2018_v25  ;;  %v2074_v25 = vld [vmem:[#allocation6 + $0x1c4] ss:$8 sps:$4 sm:$0xff]  }
 0x1f5   : > { %v531_v51 = vmul.f32 1.442695, %v524_v50  ;;  %1202 = vmatprep.subr.bf16.mxu0 %v2019_v26  ;;  %v2051_v50 = vld [vmem:[#allocation6 + $0x150] ss:$8 sps:$4 sm:$0xff]  }
 0x1f6   : > { %v2075_v26 = vld [vmem:[#allocation6 + $0x1d0] ss:$8 sps:$4 sm:$0xff]  }
 0x1f7   : > { %2140 = vpow2.f32 %v531_v51  ;;  %v2056_v51 = vld [vmem:[#allocation6 + $0x164] ss:$8 sps:$4 sm:$0xff]  }
 0x1f8   : > { %1203 = vmatpush1.bf16.msra.mxu0 %v2021_v27  ;;  %v2082_v27 = vld [vmem:[#allocation6 + $0x1e4] ss:$8 sps:$4 sm:$0xff]  }
 0x1f9   : > { %v2648_v52 = vpop.eup %2138  ;;  %1204 = vmatprep.subr.bf16.mxu0 %v2022_v28  ;;  %v2085_v28 = vld [vmem:[#allocation6 + $0x1f4] ss:$8 sps:$4 sm:$0xff]  }
 0x1fa   : > { %v539_v53 = vsel %vm508_vm0, %v2648_v52, 0.0 }
 0x1fb   : > { %540 = vadd.xlane.f32.xlu0 %v539_v53  ;;  %v2054_v53 = vld [vmem:[#allocation6 + $0x160] ss:$8 sps:$4 sm:$0xff]  }
 0x1fc   : > { %1205 = vmatpush1.bf16.msra.mxu0 %v2024_v29  ;;  %v2083_v29 = vld [vmem:[#allocation6 + $0x1f0] ss:$8 sps:$4 sm:$0xff]  }
 0x1fd   : > { %1206 = vmatprep.subr.bf16.mxu0 %v2025_v30  ;;  %v2086_v30 = vld [vmem:[#allocation8] ss:$8 sps:$4 sm:$0xff]  }
 0x200   : > { %1207 = vmatpush1.bf16.msra.mxu0 %v2027_v31  ;;  %v2088_v31 = vld [vmem:[#allocation8 + $0x4] ss:$8 sps:$4 sm:$0xff]  }
 0x201   : > { %v2652_v54 = vpop.eup %2140  ;;  %1208 = vmatprep.subr.bf16.mxu0 %v2028_v32  ;;  %v2091_v32 = vld [vmem:[#allocation8 + $0x14] ss:$8 sps:$4 sm:$0xff]  }
 0x202   : > { %v542_v55 = vsel %vm508_vm0, %v2652_v54, 0.0 }
 0x203   : > { %543 = vadd.xlane.f32.xlu1 %v542_v55 }
 0x204   : > { %1209 = vmatpush1.bf16.msra.mxu0 %v2030_v33  ;;  %v2089_v33 = vld [vmem:[#allocation8 + $0x10] ss:$8 sps:$4 sm:$0xff]  }
 0x205   : > { %1210 = vmatprep.subr.bf16.mxu0 %v2031_v34  ;;  %v2094_v34 = vld [vmem:[#allocation8 + $0x24] ss:$8 sps:$4 sm:$0xff]  }
 0x208   : > { %1211 = vmatpush1.bf16.msra.mxu0 %v2033_v35  ;;  %v2092_v35 = vld [vmem:[#allocation8 + $0x20] ss:$8 sps:$4 sm:$0xff]  }
 0x209   : > { %1233 = vmatprep.subr.bf16.mxu0 %v2037_v36  ;;  %v2097_v36 = vld [vmem:[#allocation8 + $0x34] ss:$8 sps:$4 sm:$0xff]  }
 0x20b   : > { %1213 = vmatmul.mubr.bf16.vlgmr.msra.gmra.mrb[0].mxu0 %v1772_v37  ;;  %v2095_v37 = vld [vmem:[#allocation8 + $0x30] ss:$8 sps:$4 sm:$0xff]  }
 0x20c   : > { %1234 = vmatpush1.bf16.msra.mxu0 %v2035_v38  ;;  %1222 = vmatprep.mubr.bf16.mxu0 %v1775_v11  ;;  %v2100_v38 = vld [vmem:[#allocation8 + $0x44] ss:$8 sps:$4 sm:$0xff]  }
 0x20d   : > { %1235 = vmatprep.subr.bf16.mxu0 %v2041_v39  ;;  %v2098_v39 = vld [vmem:[#allocation8 + $0x40] ss:$8 sps:$4 sm:$0xff]  }
 0x210   : > { %1236 = vmatpush1.bf16.msra.mxu0 %v2039_v40  ;;  %v2103_v40 = vld [vmem:[#allocation8 + $0x54] ss:$8 sps:$4 sm:$0xff]  }
 0x211   : > { %1237 = vmatprep.subr.bf16.mxu0 %v2044_v41  ;;  %v2101_v41 = vld [vmem:[#allocation8 + $0x50] ss:$8 sps:$4 sm:$0xff]  }
 0x214   : > { %1238 = vmatpush1.bf16.msra.mxu0 %v2042_v43 }
 0x215   : > { %1239 = vmatprep.subr.bf16.mxu0 %v2047_v44 }
 0x218   : > { %1240 = vmatpush1.bf16.msra.mxu0 %v2045_v45 }
 0x219   : > { %1241 = vmatprep.subr.bf16.mxu0 %v2050_v46 }
 0x21c   : > { %1242 = vmatpush1.bf16.msra.mxu0 %v2048_v48  ;;  %v759_v48 = vstv %s758_s28  ;;  %s2274_s28 = scalar_lea.vmem %s2273_s14, 2048 }
 0x21d   : > { %1243 = vmatprep.subr.bf16.mxu0 %v2053_v49  ;;  %v310_v49 = vunpack.c.l.bf16 %v2582_v1  ;;  %p2276_p9 = scmp.lt.s32.totalorder %s2274_s28, %s2268_s11 }
 0x21f   : > { %p2277_p12 = por %p2276_p9, %p2275_p7 }
 0x220   : > { %1244 = vmatpush1.bf16.msra.mxu0 %v2051_v50  ;;  %v309_v50 = vunpack.c.h.bf16 %v2580_v0 }
 0x221   : > { %1245 = vmatprep.subr.bf16.mxu0 %v2056_v51  ;;  %p2278_p1 = pnand %p2277_p12, %p2271_p3 }
 0x224   : > { %1246 = vmatpush1.bf16.msra.mxu0 %v2054_v53 }
 0x225   : > { %1247 = vmatprep.subr.bf16.mxu0 %v2059_v56  ;;  %v308_v56 = vunpack.c.l.bf16 %v2580_v0 }
 0x228   : > { %1248 = vmatpush1.bf16.msra.mxu0 %v2057_v58 }
 0x229   : > { %1249 = vmatprep.subr.bf16.mxu0 %v2062_v59 }
 0x22c   : > { %1250 = vmatpush1.bf16.msra.mxu0 %v2060_v60 }
 0x22d   : > { %1251 = vmatprep.subr.bf16.mxu0 %v2065_v62 }
 0x230   : > { %1252 = vmatpush1.bf16.msra.mxu0 %v2063_v2 }
 0x231   : > { %1253 = vmatprep.subr.bf16.mxu0 %v2068_v4 }
 0x234   : > { %1254 = vmatpush1.bf16.msra.mxu0 %v2066_v14 }
 0x235   : > { %1255 = vmatprep.subr.bf16.mxu0 %v2071_v16 }
 0x238   : > { %1256 = vmatpush1.bf16.msra.mxu0 %v2069_v17 }
 0x239   : > { %1257 = vmatprep.subr.bf16.mxu0 %v2074_v25 }
 0x278   : > { %v535_v55 = vpop.xlane.xlu0 %534 }
 0x279   : > { %2142 = vrcp.f32 %v535_v55  ;;  %v311_v55 = vunpack.c.h.bf16 %v2582_v1 }
 0x280   : > { %v538_v61 = vpop.xlane.xlu1 %537 }
 0x281   : > { %2144 = vrcp.f32 %v538_v61 }
 0x283   : > { %v2143_v63 = vpop.eup %2142 }
 0x284   : > { %v549_v3 = vmul.f32 %v2143_v63, %v2640_v42 }
 0x286   : > { %v553_v12 = vpack.c.bf16 %v549_v3, %v549_v3 }
 0x288   : > { %1765 = vmatmul.mubr.msk.bf16.vlgmr.msra.gmra.mrb[16].mxu1 %vm508_vm0, %v553_v12  ;;  %v541_v15 = vpop.xlane.xlu0 %540 }
 0x289   : > { %2146 = vrcp.f32 %v541_v15  ;;  %618 = vmatpush1.bf16.msra.mxu1 %v612_v13  ;;  %649 = vmatprep.mubr.bf16.mxu1 %v2345_v57 }
 0x28a   : > { %1768 = vmatprep.subr.msk.bf16.mxu1 %vm560_vm1, %v2608_v7 }
 0x28b   : > { %v2145_v42 = vpop.eup %2144 }
 0x28c   : > { %v550_v18 = vmul.f32 %v2145_v42, %v2644_v47 }
 0x28e   : > { %v554_v6 = vpack.c.bf16 %v550_v18, %v550_v18  ;;  %v314_v18 = vunpack.c.l.bf16 %v2613_v8 }
 0x290   : > { %1767 = vmatmul.mubr.msk.bf16.vlgmr.msra.gmra.mrb[20].mxu1 %vm508_vm0, %v554_v6  ;;  %v544_v20 = vpop.xlane.xlu1 %543  ;;  %v313_v6 = vunpack.c.h.bf16 %v2599_v5 }
 0x291   : > { %2148 = vrcp.f32 %v544_v20  ;;  %668 = vmatpush1.bf16.msra.mxu1 %v662_v19  ;;  %699 = vmatprep.mubr.bf16.mxu1 %v2345_v57 }
 0x292   : > { %1770 = vmatprep.subr.msk.bf16.mxu1 %vm560_vm1, %v2622_v10  ;;  %v2072_v10 = vld [vmem:[#allocation6 + $0x1c0] ss:$8 sps:$4 sm:$0xff]  }
 0x293   : > { %v2147_v7 = vpop.eup %2146  ;;  %1258 = vmatpush1.bf16.msra.mxu0 %v2072_v10 }
 0x294   : > { %v551_v21 = vmul.f32 %v2147_v7, %v2648_v52  ;;  %v2077_v52 = vld [vmem:[#allocation6 + $0x1d4] ss:$8 sps:$4 sm:$0xff]   ;;  %v315_v7 = vunpack.c.h.bf16 %v2613_v8 }
 0x295   : > { %1259 = vmatprep.subr.bf16.mxu0 %v2077_v52 }
 0x296   : > { %v555_v47 = vpack.c.bf16 %v551_v21, %v551_v21  ;;  %v312_v21 = vunpack.c.l.bf16 %v2599_v5 }
 0x297   : > { %1260 = vmatpush1.bf16.msra.mxu0 %v2075_v26 }
 0x298   : > { %1769 = vmatmul.mubr.msk.bf16.vlgmr.msra.gmra.mrb[24].mxu1 %vm508_vm0, %v555_v47  ;;  %1261 = vmatprep.subr.bf16.mxu0 %v2082_v27 }
 0x299   : > { %718 = vmatpush1.bf16.msra.mxu1 %v712_v22  ;;  %749 = vmatprep.mubr.bf16.mxu1 %v2345_v57  ;;  %v1774_v57 = vcombine.low %v2599_v5, %v2613_v8 }
 0x29a   : > { %1574 = vmatprep.subr.bf16.mxu1 %v2088_v31  ;;  %v2112_v31 = vld [vmem:[#allocation8 + $0x84] ss:$8 sps:$4 sm:$0xff]  }
 0x29b   : > { %v2149_v9 = vpop.eup %2148  ;;  %1223 = vmatmul.mubr.bf16.gmra.mrb[4].mxu0 %v1774_v57 }
 0x29c   : > { %v552_v23 = vmul.f32 %v2149_v9, %v2652_v54  ;;  %v2080_v54 = vld [vmem:[#allocation6 + $0x1e0] ss:$8 sps:$4 sm:$0xff]  }
 0x29d   : > { %1262 = vmatpush1.bf16.msra.mxu0 %v2080_v54  ;;  %v2106_v54 = vld [vmem:[#allocation8 + $0x64] ss:$8 sps:$4 sm:$0xff]  }
 0x29e   : > { %v556_v24 = vpack.c.bf16 %v552_v23, %v552_v23  ;;  %1263 = vmatprep.subr.bf16.mxu0 %v2085_v28  ;;  %v2104_v28 = vld [vmem:[#allocation8 + $0x60] ss:$8 sps:$4 sm:$0xff]  }
 0x2a0   : > { %1771 = vmatmul.mubr.msk.bf16.vlgmr.msra.gmra.mrb[28].mxu1 %vm508_vm0, %v556_v24 }
 0x2a1   : > { %1264 = vmatpush1.bf16.msra.mxu0 %v2083_v29  ;;  %1575 = vmatpush1.bf16.msra.mxu1 %v2086_v30  ;;  %v2109_v29 = vld [vmem:[#allocation8 + $0x74] ss:$8 sps:$4 sm:$0xff]   ;;  %v2107_v30 = vld [vmem:[#allocation8 + $0x70] ss:$8 sps:$4 sm:$0xff]  }
 0x2a2   : > { %1576 = vmatprep.subr.bf16.mxu1 %v2091_v32  ;;  %v2110_v32 = vld [vmem:[#allocation8 + $0x80] ss:$8 sps:$4 sm:$0xff]  }
 0x2a5   : > { %1577 = vmatpush1.bf16.msra.mxu1 %v2089_v33  ;;  %v2115_v33 = vld [vmem:[#allocation8 + $0x94] ss:$8 sps:$4 sm:$0xff]  }
 0x2a6   : > { %1578 = vmatprep.subr.bf16.mxu1 %v2094_v34  ;;  %v2113_v34 = vld [vmem:[#allocation8 + $0x90] ss:$8 sps:$4 sm:$0xff]  }
 0x2a9   : > { %1579 = vmatpush1.bf16.msra.mxu1 %v2092_v35  ;;  %v2118_v35 = vld [vmem:[#allocation8 + $0xa4] ss:$8 sps:$4 sm:$0xff]  }
 0x2aa   : > { %1580 = vmatprep.subr.bf16.mxu1 %v2097_v36  ;;  %v2116_v36 = vld [vmem:[#allocation8 + $0xa0] ss:$8 sps:$4 sm:$0xff]  }
 0x2ad   : > { %1581 = vmatpush1.bf16.msra.mxu1 %v2095_v37  ;;  %v2121_v37 = vld [vmem:[#allocation8 + $0xb4] ss:$8 sps:$4 sm:$0xff]  }
 0x2ae   : > { %1582 = vmatprep.subr.bf16.mxu1 %v2100_v38  ;;  %v2119_v38 = vld [vmem:[#allocation8 + $0xb0] ss:$8 sps:$4 sm:$0xff]  }
 0x2b1   : > { %1583 = vmatpush1.bf16.msra.mxu1 %v2098_v39  ;;  %v2124_v39 = vld [vmem:[#allocation8 + $0xc4] ss:$8 sps:$4 sm:$0xff]  }
 0x2b2   : > { %1584 = vmatprep.subr.bf16.mxu1 %v2103_v40  ;;  %v2122_v40 = vld [vmem:[#allocation8 + $0xc0] ss:$8 sps:$4 sm:$0xff]  }
 0x2b5   : > { %1585 = vmatpush1.bf16.msra.mxu1 %v2101_v41  ;;  %v2127_v41 = vld [vmem:[#allocation8 + $0xd4] ss:$8 sps:$4 sm:$0xff]  }
 0x2b6   : > { %1586 = vmatprep.subr.bf16.mxu1 %v2106_v54 }
 0x2b9   : > { %1587 = vmatpush1.bf16.msra.mxu1 %v2104_v28 }
 0x2ba   : > { %1588 = vmatprep.subr.bf16.mxu1 %v2109_v29 }
 0x2bd   : > { %1589 = vmatpush1.bf16.msra.mxu1 %v2107_v30 }
 0x2be   : > { %1590 = vmatprep.subr.bf16.mxu1 %v2112_v31 }
 0x2c1   : > { %1591 = vmatpush1.bf16.msra.mxu1 %v2110_v32 }
 0x2c2   : > { %1592 = vmatprep.subr.bf16.mxu1 %v2115_v33 }
 0x2c5   : > { %1593 = vmatpush1.bf16.msra.mxu1 %v2113_v34 }
 0x2c6   : > { %1594 = vmatprep.subr.bf16.mxu1 %v2118_v35 }
 0x2c9   : > { %1595 = vmatpush1.bf16.msra.mxu1 %v2116_v36 }
 0x2ca   : > { %1596 = vmatprep.subr.bf16.mxu1 %v2121_v37 }
 0x2cd   : > { %1597 = vmatpush1.bf16.msra.mxu1 %v2119_v38 }
 0x2ce   : > { %1598 = vmatprep.subr.bf16.mxu1 %v2124_v39 }
 0x2d1   : > { %1599 = vmatpush1.bf16.msra.mxu1 %v2122_v40 }
 0x2d2   : > { %1600 = vmatprep.subr.bf16.mxu1 %v2127_v41 }
 0x35b   : > { %v601_v43 = vpop.f32.mrb[16].mxu1 }
 0x35c   : > { %v603_v44 = vpop.f32.mrb[17].mxu1  ;;  %v760_v58 = vmul.f32 %v759_v48, %v601_v43  ;;  %v2125_v43 = vld [vmem:[#allocation8 + $0xd0] ss:$8 sps:$4 sm:$0xff]  }
 0x35d   : > { %v605_v45 = vpop.f32.mrb[18].mxu1  ;;  %v761_v51 = vmul.f32 %v759_v48, %v603_v44  ;;  %1601 = vmatpush1.bf16.msra.mxu1 %v2125_v43  ;;  %v2130_v44 = vld [vmem:[#allocation8 + $0xe4] ss:$8 sps:$4 sm:$0xff]  }
 0x35e   : > { %v606_v46 = vpop.f32.mrb[19].mxu1  ;;  %v2710_v12 = vadd.f32 %v760_v58, %v308_v56  ;;  %v2128_v45 = vld [vmem:[#allocation8 + $0xe0] ss:$8 sps:$4 sm:$0xff]   ;;  %1602 = vmatprep.subr.bf16.mxu1 %v2130_v44 }
 0x35f   : > { %v2702_v3 = vadd.f32 %v761_v51, %v309_v50  ;;  %v2133_v46 = vld [vmem:[#allocation8 + $0xf4] ss:$8 sps:$4 sm:$0xff]   ;;  %v850_v51 = vlaneseq }
 0x361   : > { %1603 = vmatpush1.bf16.msra.mxu1 %v2128_v45 }
 0x362   : > { %1604 = vmatprep.subr.bf16.mxu1 %v2133_v46 }
 0x363   : > { %v651_v53 = vpop.f32.mrb[20].mxu1 }
 0x364   : > { %v762_v59 = vmul.f32 %v759_v48, %v651_v53  ;;  %v653_v60 = vpop.f32.mrb[21].mxu1  ;;  %v2740_v53 = vshrl.u32 %v850_v51, 7 }
 0x365   : > { %v763_v61 = vmul.f32 %v759_v48, %v653_v60  ;;  %v655_v62 = vpop.f32.mrb[22].mxu1 }
 0x366   : > { %v2698_v63 = vadd.f32 %v762_v59, %v310_v49  ;;  %v656_v2 = vpop.f32.mrb[23].mxu1  ;;  %v852_v58 = vsub.s32 0, %v2740_v53  ;;  %v848_v59 = vld [vmem:[%s2836_s3] sm:$0x3]  ;;  %v856_v60 = vsub.s32 1, %v2740_v53 }
 0x367   : > { %v2706_v4 = vadd.f32 %v763_v61, %v311_v55 }
 0x368   : > { %v778_v14 = vpack.c.bf16 %v2698_v63, %v2710_v12  ;;  %v853_v61 = vrot.slane %v848_v59, %v852_v58  ;;  %v857_v62 = vrot.slane %v848_v59, %v856_v60 }
 0x369   : > { %v779_v13 = vpack.c.bf16 %v2706_v4, %v2702_v3 }
 0x36b   : > { %v701_v15 = vpop.f32.mrb[24].mxu1  ;;  %1265 = vmatprep.mubr.bf16.mxu0 %v779_v13 }
 0x36c   : > { %v703_v16 = vpop.f32.mrb[25].mxu1  ;;  %1266 = vmatmul.mubr.bf16.vlgmr.msra.gmra.mrb[0].mxu0 %v778_v14  ;;  %v764_v47 = vmul.f32 %v759_v48, %v701_v15 }
 0x36d   : > { %v705_v42 = vpop.f32.mrb[26].mxu1  ;;  %v765_v19 = vmul.f32 %v759_v48, %v703_v16 }
 0x36e   : > { %v706_v17 = vpop.f32.mrb[27].mxu1  ;;  %v2734_v11 = vadd.f32 %v764_v47, %v312_v21 }
 0x36f   : > { %v2726_v52 = vadd.f32 %v765_v19, %v313_v6 }
 0x373   : > { %v751_v20 = vpop.f32.mrb[28].mxu1 }
 0x374   : > { %v766_v22 = vmul.f32 %v759_v48, %v751_v20  ;;  %v753_v9 = vpop.f32.mrb[29].mxu1 }
 0x375   : > { %v767_v23 = vmul.f32 %v759_v48, %v753_v9  ;;  %v755_v24 = vpop.f32.mrb[30].mxu1  ;;  %v2131_v48 = vld [vmem:[#allocation8 + $0xf0] ss:$8 sps:$4 sm:$0xff]  }
 0x376   : > { %v2722_v25 = vadd.f32 %v766_v22, %v314_v18  ;;  %v756_v10 = vpop.f32.mrb[31].mxu1  ;;  %1605 = vmatpush1.bf16.msra.mxu1 %v2131_v48 }
 0x377   : > { %v2730_v26 = vadd.f32 %v767_v23, %v315_v7 }
 0x378   : > { %v782_v27 = vpack.c.bf16 %v2722_v25, %v2734_v11 }
 0x379   : > { %v783_v57 = vpack.c.bf16 %v2730_v26, %v2726_v52 }
 0x37b   : > { %1275 = vmatprep.mubr.bf16.mxu0 %v783_v57 }
 0x37c   : > { %1276 = vmatmul.mubr.bf16.gmra.mrb[4].mxu0 %v782_v27 }
 0x43f   : > { %v1267_v2 = vpop.f32.mrb[0].mxu0 }
 0x440   : > { %v1890_v13 = vadd.f32 %v1267_v2, %v853_v61  ;;  %v1269_v14 = vpop.f32.mrb[1].mxu0 }
 0x441   : > { %v1891_v15 = vadd.f32 %v1269_v14, %v857_v62  ;;  %v1271_v16 = vpop.f32.mrb[2].mxu0 }
 0x442   : > { %v1840_v42 = vmul.f32 -1.442695, %v1890_v13  ;;  %v1892_v17 = vadd.f32 %v1271_v16, %v853_v61  ;;  %v1273_v19 = vpop.f32.mrb[3].mxu0 }
 0x443   : > { %v1841_v20 = vmul.f32 -1.442695, %v1891_v15  ;;  %v1893_v47 = vadd.f32 %v1273_v19, %v857_v62 }
 0x444   : > { %2150 = vpow2.f32 %v1840_v42  ;;  %v1842_v22 = vmul.f32 -1.442695, %v1892_v17 }
 0x445   : > { %2152 = vpow2.f32 %v1841_v20  ;;  %v1843_v9 = vmul.f32 -1.442695, %v1893_v47 }
 0x446   : > { %2154 = vpow2.f32 %v1842_v22 }
 0x447   : > { %2156 = vpow2.f32 %v1843_v9 }
 0x44e   : > { %v2151_v23 = vpop.eup %2150 }
 0x44f   : > { %v2153_v24 = vpop.eup %2152  ;;  %v1310_v10 = vadd.f32 1.0, %v2151_v23  ;;  %v1277_v57 = vpop.f32.mrb[4].mxu0 }
 0x450   : > { %v2155_v27 = vpop.eup %2154  ;;  %v1311_v54 = vadd.f32 1.0, %v2153_v24  ;;  %v1894_v28 = vadd.f32 %v1277_v57, %v853_v61  ;;  %v1279_v29 = vpop.f32.mrb[5].mxu0 }
 0x451   : > { %v2157_v30 = vpop.eup %2156  ;;  %2158 = vrcp.f32 %v1310_v10  ;;  %v1312_v31 = vadd.f32 1.0, %v2155_v27  ;;  %v1895_v32 = vadd.f32 %v1279_v29, %v857_v62  ;;  %v1281_v33 = vpop.f32.mrb[6].mxu0 }
 0x452   : > { %2160 = vrcp.f32 %v1311_v54  ;;  %v1313_v34 = vadd.f32 1.0, %v2157_v30  ;;  %v1844_v35 = vmul.f32 -1.442695, %v1894_v28  ;;  %v1896_v36 = vadd.f32 %v1281_v33, %v853_v61  ;;  %v1283_v37 = vpop.f32.mrb[7].mxu0 }
 0x453   : > { %2162 = vrcp.f32 %v1312_v31  ;;  %v1845_v38 = vmul.f32 -1.442695, %v1895_v32  ;;  %v1897_v39 = vadd.f32 %v1283_v37, %v857_v62 }
 0x454   : > { %2164 = vrcp.f32 %v1313_v34  ;;  %v1846_v40 = vmul.f32 -1.442695, %v1896_v36 }
 0x455   : > { %2166 = vpow2.f32 %v1844_v35  ;;  %v1847_v41 = vmul.f32 -1.442695, %v1897_v39 }
 0x456   : > { %2168 = vpow2.f32 %v1845_v38 }
 0x457   : > { %2170 = vpow2.f32 %v1846_v40 }
 0x458   : > { %2172 = vpow2.f32 %v1847_v41 }
 0x45b   : > { %v2159_v43 = vpop.eup %2158 }
 0x45c   : > { %v2161_v44 = vpop.eup %2160  ;;  %v1342_v45 = vsub.f32 1.0, %v2159_v43  ;;  %v1334_v16 = vmul.f32 %v2159_v43, %v308_v56 }
 0x45d   : > { %v2163_v46 = vpop.eup %2162  ;;  %v1343_v48 = vsub.f32 1.0, %v2161_v44  ;;  %v1335_v47 = vmul.f32 %v2161_v44, %v309_v50 }
 0x45e   : > { %v2165_v51 = vpop.eup %2164  ;;  %v1344_v59 = vsub.f32 1.0, %v2163_v46  ;;  %v1350_v61 = vmul.f32 %v1342_v45, %v2710_v12  ;;  %v1336_v42 = vmul.f32 %v2163_v46, %v310_v49 }
 0x45f   : > { %v2167_v2 = vpop.eup %2166  ;;  %v1345_v13 = vsub.f32 1.0, %v2165_v51  ;;  %v1351_v62 = vmul.f32 %v1343_v48, %v2702_v3  ;;  %v1337_v12 = vmul.f32 %v2165_v51, %v311_v55 }
 0x460   : > { %v2169_v14 = vpop.eup %2168  ;;  %v1314_v15 = vadd.f32 1.0, %v2167_v2  ;;  %v1352_v17 = vmul.f32 %v1344_v59, %v2698_v63  ;;  %v1358_v23 = vadd.f32 %v1350_v61, %v1334_v16 }
 0x461   : > { %v2171_v19 = vpop.eup %2170  ;;  %v1315_v20 = vadd.f32 1.0, %v2169_v14  ;;  %v1353_v3 = vmul.f32 %v1345_v13, %v2706_v4  ;;  %v1359_v49 = vadd.f32 %v1351_v62, %v1335_v47 }
 0x462   : > { %v2173_v22 = vpop.eup %2172  ;;  %2174 = vrcp.f32 %v1314_v15  ;;  %v1316_v9 = vadd.f32 1.0, %v2171_v19  ;;  %v1360_v56 = vadd.f32 %v1352_v17, %v1336_v42 }
 0x463   : > { %2176 = vrcp.f32 %v1315_v20  ;;  %v1317_v24 = vadd.f32 1.0, %v2173_v22  ;;  %v1361_v10 = vadd.f32 %v1353_v3, %v1337_v12 }
 0x464   : > { %2178 = vrcp.f32 %v1316_v9  ;;  %v1366_v63 = vpack.c.bf16 %v1360_v56, %v1358_v23 }
 0x465   : > { %2180 = vrcp.f32 %v1317_v24  ;;  %v1367_v57 = vpack.c.bf16 %v1361_v10, %v1359_v49 }
 0x467   : > { %1606 = vmatprep.mubr.bf16.mxu1 %v1367_v57 }
 0x468   : > { %1607 = vmatmul.mubr.bf16.vlgmr.msra.gmra.mrb[32].mxu1 %v1366_v63 }
 0x46c   : > { %v2175_v0 = vpop.eup %2174 }
 0x46d   : > { %v2177_v1 = vpop.eup %2176  ;;  %v1346_v50 = vsub.f32 1.0, %v2175_v0  ;;  %v1338_v31 = vmul.f32 %v2175_v0, %v312_v21 }
 0x46e   : > { %v2179_v55 = vpop.eup %2178  ;;  %v1347_v4 = vsub.f32 1.0, %v2177_v1  ;;  %v1339_v34 = vmul.f32 %v2177_v1, %v313_v6 }
 0x46f   : > { %v2181_v27 = vpop.eup %2180  ;;  %v1348_v54 = vsub.f32 1.0, %v2179_v55  ;;  %v1354_v28 = vmul.f32 %v1346_v50, %v2734_v11  ;;  %v1340_v32 = vmul.f32 %v2179_v55, %v314_v18  ;;  %v1402_v18 = vld [vmem:[%s2838_s5] sm:$0x3] }
 0x470   : > { %v1349_v29 = vsub.f32 1.0, %v2181_v27  ;;  %v1355_v30 = vmul.f32 %v1347_v4, %v2726_v52  ;;  %v1341_v35 = vmul.f32 %v2181_v27, %v315_v7  ;;  %v1407_v5 = vrot.slane %v1402_v18, %v852_v58 }
 0x471   : > { %v1356_v33 = vmul.f32 %v1348_v54, %v2722_v25  ;;  %v1362_v36 = vadd.f32 %v1354_v28, %v1338_v31  ;;  %v1411_v8 = vrot.slane %v1402_v18, %v856_v60 }
 0x472   : > { %v1357_v11 = vmul.f32 %v1349_v29, %v2730_v26  ;;  %v1363_v52 = vadd.f32 %v1355_v30, %v1339_v34 }
 0x473   : > { %v1364_v37 = vadd.f32 %v1356_v33, %v1340_v32 }
 0x474   : > { %v1365_v38 = vadd.f32 %v1357_v11, %v1341_v35 }
 0x475   : > { %v1368_v39 = vpack.c.bf16 %v1364_v37, %v1362_v36 }
 0x476   : > { %v1369_v40 = vpack.c.bf16 %v1365_v38, %v1363_v52 }
 0x478   : > { %1616 = vmatprep.mubr.bf16.mxu1 %v1369_v40 }
 0x479   : > { %1617 = vmatmul.mubr.bf16.gmra.mrb[36].mxu1 %v1368_v39 }
 0x53b   : > { %v1608_v6 = vpop.f32.mrb[32].mxu1 }
 0x53c   : > { %v1609_v7 = vadd.f32 %v1608_v6, %v1407_v5  ;;  %v1610_v21 = vpop.f32.mrb[33].mxu1 }
 0x53d   : > { %v1611_v25 = vadd.f32 %v1610_v21, %v1411_v8  ;;  %v1612_v26 = vpop.f32.mrb[34].mxu1 }
 0x53e   : > { %1627 = vst [vmem:[%s300_s17] sm:$0xff] %v1609_v7  ;;  %v1613_v41 = vadd.f32 %v1612_v26, %v1407_v5  ;;  %v1614_v43 = vpop.f32.mrb[35].mxu1 }
 0x53f   : > { %1628 = vst [vmem:[%s300_s17 + $0x8] sm:$0xff] %v1611_v25  ;;  %v1615_v44 = vadd.f32 %v1614_v43, %v1411_v8 }
 0x540   : > { %1629 = vst [vmem:[%s300_s17 + $0x10] sm:$0xff] %v1613_v41 }
 0x541   : > { %1630 = vst [vmem:[%s300_s17 + $0x18] sm:$0xff] %v1615_v44 }
 0x54c   : > { %v1618_v58 = vpop.f32.mrb[36].mxu1 }
 0x54d   : > { %v1619_v53 = vadd.f32 %v1618_v58, %v1407_v5  ;;  %v1620_v60 = vpop.f32.mrb[37].mxu1 }
 0x54e   : > { %v1621_v45 = vadd.f32 %v1620_v60, %v1411_v8  ;;  %v1622_v46 = vpop.f32.mrb[38].mxu1 }
 0x54f   : > { %1631 = vst [vmem:[%s300_s17 + $0x20] sm:$0xff] %v1619_v53  ;;  %v1623_v48 = vadd.f32 %v1622_v46, %v1407_v5  ;;  %v1624_v51 = vpop.f32.mrb[39].mxu1 }
 0x550   : > { %1632 = vst [vmem:[%s300_s17 + $0x28] sm:$0xff] %v1621_v45  ;;  %v1625_v59 = vadd.f32 %v1624_v51, %v1411_v8 }
 0x551   : > { %1633 = vst [vmem:[%s300_s17 + $0x30] sm:$0xff] %v1623_v48 }
 0x552   : > { %1634 = vst [vmem:[%s300_s17 + $0x38] sm:$0xff] %v1625_v59 }
 0x553   : > { %2281 = shalt.err (!%p2278_p1)
}
 0x554   : > { %s2282_s30 = scalar_lea.hbm %s2789_s12, 1024  ;;  %s2286_s15 = scalar_lea.hbm %s2839_s6, 2048 }
 0x555   : > { %p2283_p13 = scmp.ne.s32.totalorder %s2789_s12, %s2282_s30  ;;  %p2287_p4 = scmp.lt.u32.totalorder %s2789_s12, %s2839_s6 }
 0x556   : > { %p2288_p5 = scmp.lt.u32.totalorder %s2286_s15, %s2282_s30  ;;  %p2290_p8 = scmp.lt.u32.totalorder %s2282_s30, %s2789_s12 }
 0x557   : > { %p2284_p6 = pnand %p2283_p13, %p2853_p0 }
 0x558   : > { %p2289_p11 = por %p2288_p5, %p2287_p4 }
 0x559   : > { %p2285_p10 = pneg %p2284_p6 }
 0x55a   : > { %p2291_p2 = por %p2290_p8, %p2289_p11 }
 0x55c   : > { %p2292_p3 = pnand %p2291_p2, %p2285_p10 }
 0x55e   : > { %2295 = shalt.err (!%p2292_p3)
}
 0x55f   : > { %s2347_s10 = smov 256   ;;  %s2348_s16 = smov 16  }
 0x560   : > { %1916 = dma.vmem_to_hbm [thread:$0]  (%p2853_p0), %s2784_s18, 1024, %s2789_s12, %s1636_s0, %s2347_s10, %s2347_s10, %s2348_s16  }
 0x561 PF: > { %s1665_s22 = sand.u32 1, %s2326_s23   ;;  %p2854_p7 = scmp.ne.s32.totalorder %s2844_s29, 0 }
 0x562   : > { %p2855_p9 = scmp.ge.s32.totalorder %s2338_s26, 2  ;;  %s1666_s11 = scalar_lea.sflag [#allocation5], %s1665_s22 }
 0x564   : > { %p1930_p12 = pnand %p2855_p9, %p2854_p7 }
 0x566   : > { %2321 = dma.done.wait (!%p1930_p12), %s1666_s11, 1024  }
 0x567   : > { %2323 = vsyncadd (!%p1930_p12), %s1666_s11, 4294966272  ;;  %p21_p1 = scmp.ge.s32.totalorder %s2503_s9, 4   ;;  %s2856_s23 = smov %s2330_s24 }
 0x568   : > { %s2857_s24 = smov %s2334_s25  ;;  %s2858_s25 = smov %s2519_s7 }
 0x569   : > { %s2859_s26 = smov %s2503_s9  ;;  %23 = sbr.rel (!%p21_p1) target bundleno = 8 (0x8), region = 97 }
 0x570   :  { %1671 = vsyncpa [#allocation4], 1 }
 0x571   :  { %1673 = vsyncpa [#allocation4 + $0x1], 1 }
 0x572   :  { %1674 = vsyncpa [#allocation7], 1 }
 0x573   :  { %1675 = vsyncpa [#allocation5], 1 }
 0x574   :  { %1677 = vsyncpa [#allocation5 + $0x1], 1 }

</bundles_post_ra>
